<compile_context>
chip_gen: v7x
topology: tpu7x:2x2x1
jax: 0.10.0
libtpu: 0.0.40
codegen_flags: <defaults>
</compile_context>

<pallas_src>
import functools

import numpy as np

import jax
import jax.numpy as jnp
from jax.experimental import pallas as pl
from jax.experimental.pallas import tpu as pltpu


# ----------------------------------------------------------------------------
# Padding helper (same math as the reference Interactor)
# ----------------------------------------------------------------------------
def _pads(kernel_size):
    if kernel_size % 2 == 0:
        return (kernel_size - 2) // 2 + 1, kernel_size // 2 + 1
    return (kernel_size - 1) // 2 + 1, (kernel_size - 1) // 2 + 1


# ----------------------------------------------------------------------------
# Fused, level-paired EncoderTree kernel
# ----------------------------------------------------------------------------
def _build_encoder_tree_kernel(num_levels, kernel_size, pad_l, pad_r):
    K = kernel_size

    def kernel(*refs):
        x_ref = refs[0]
        w_refs = refs[1:1 + 8 * num_levels]      # 8 packed arrays per depth
        out_refs = refs[1 + 8 * num_levels:]     # one slab per depth
        f32 = jnp.float32

        def parity_select(half, full, parity):
            # S[i, 2i + parity] = 1  (even/odd time split as an MXU matmul)
            r = jax.lax.broadcasted_iota(jnp.int32, (half, full), 0)
            c = jax.lax.broadcasted_iota(jnp.int32, (half, full), 1)
            return jnp.where(c == 2 * r + parity, 1.0, 0.0).astype(f32)

        def conv_chain(z, w1_ref, b1_ref, w2_ref, b2_ref):
            """ReplicationPad -> ConvK -> LeakyReLU -> (Dropout=id) -> Conv3 -> Tanh.

            z: (L, C) with lanes packing (instance, batch, channel).  The packed
            weights are block-structured over instances, so all subnets at this
            depth run in the same two matmuls.
            """
            L, C = z.shape
            zp = jnp.concatenate(
                [jnp.broadcast_to(z[0:1, :], (pad_l, C)), z,
                 jnp.broadcast_to(z[L - 1:L, :], (pad_r, C))], axis=0)
            l1 = L + pad_l + pad_r - K + 1
            # im2col: K time-shifted slices stacked on the lane axis -> one dot.
            zc = jnp.concatenate([zp[k:k + l1, :] for k in range(K)], axis=-1)
            h = jnp.dot(zc, w1_ref[...], preferred_element_type=f32) + b1_ref[...]
            h = jnp.where(h >= 0.0, h, 0.01 * h)          # LeakyReLU(0.01)
            l2 = l1 - 3 + 1                               # == L
            hc = jnp.concatenate([h[k:k + l2, :] for k in range(3)], axis=-1)
            y = jnp.dot(hc, w2_ref[...], preferred_element_type=f32) + b2_ref[...]
            return jnp.tanh(y)

        # s: (L_t, 2^t * B * D); lanes = (node-in-packing-order, batch, channel)
        s = x_ref[...].astype(f32)
        for t in range(num_levels):
            L = s.shape[0]
            Lh = L // 2
            wr = w_refs[8 * t:8 * (t + 1)]
            se = parity_select(Lh, L, 0)
            so = parity_select(Lh, L, 1)
            e = jnp.dot(se, s, preferred_element_type=f32)    # x_even of every node
            o = jnp.dot(so, s, preferred_element_type=f32)    # x_odd  of every node
            # phase 1: [phi_j(xe_j) | psi_j(xo_j)] for all nodes j in one chain
            p1 = conv_chain(jnp.concatenate([e, o], axis=-1),
                            wr[0], wr[1], wr[2], wr[3])
            dc = jnp.concatenate([o, e], axis=-1) * jnp.exp(p1)   # [d_j | c_j]
            # phase 2 weights are packed to emit [-P_j(c_j) | U_j(d_j)]
            p2 = conv_chain(dc, wr[4], wr[5], wr[6], wr[7])
            s = dc + p2            # [d - P(c) | c + U(d)] = [x_odd_upd | x_even_upd]
            out_refs[t][...] = s.astype(out_refs[t].dtype)
            # s feeds the next depth directly: lane half 0 -> odd children,
            # lane half 1 -> even children (weight packing follows this order).

    return kernel


# ----------------------------------------------------------------------------
# Host-side weight packing (block-diagonal over instances, batch replicated)
# ----------------------------------------------------------------------------
def _pack_phase(subnets, srcs, signs, batch):
    """Pack one phase of one depth into (W1, b1, W2, b2).

    subnets[o] = (w1 (K1,D,H), b1 (1,H), w2 (K2,H,D), b2 (1,D)) for output
    instance o; srcs[o] = input instance it reads; signs[o] multiplies the
    *second* conv (tanh is odd, so sign=-1 yields -subnet(x)).
    """
    n = len(subnets)
    K1, D, H = np.asarray(subnets[0][0]).shape
    K2 = np.asarray(subnets[0][2]).shape[0]
    W1 = np.zeros((K1, n, batch, D, n, batch, H), np.float32)
    B1 = np.zeros((n, batch, H), np.float32)
    W2 = np.zeros((K2, n, batch, H, n, batch, D), np.float32)
    B2 = np.zeros((n, batch, D), np.float32)
    for o in range(n):
        w1, b1, w2, b2 = (np.asarray(a, np.float32) for a in subnets[o])
        i, sgn = srcs[o], signs[o]
        for b in range(batch):
            W1[:, i, b, :, o, b, :] = w1
            B1[o, b, :] = b1[0]
            W2[:, o, b, :, o, b, :] = sgn * w2
            B2[o, b, :] = sgn * b2[0]
    cin = n * batch * D
    ch = n * batch * H
    return [jnp.asarray(W1.reshape(K1 * cin, ch)),
            jnp.asarray(B1.reshape(1, ch)),
            jnp.asarray(W2.reshape(K2 * ch, cin)),
            jnp.asarray(B2.reshape(1, cin))]


def pack_tree_weights(tree_params, num_levels, batch):
    """Flatten the tree parameters into 8 packed arrays per depth (BFS order)."""
    nodes = [tree_params]
    packed = []
    for t in range(num_levels):
        n = len(nodes)
        blocks = [nd["block"] for nd in nodes]
        # phase 1: input [xe_j | xo_j] -> output [phi_j(xe_j) | psi_j(xo_j)]
        packed += _pack_phase(
            [bl["phi"] for bl in blocks] + [bl["psi"] for bl in blocks],
            srcs=list(range(2 * n)), signs=[1.0] * (2 * n), batch=batch)
        # phase 2: input [d_j | c_j] -> output [-P_j(c_j) | U_j(d_j)]
        packed += _pack_phase(
            [bl["P"] for bl in blocks] + [bl["U"] for bl in blocks],
            srcs=[n + j for j in range(n)] + list(range(n)),
            signs=[-1.0] * n + [1.0] * n, batch=batch)
        if t + 1 < num_levels:
            # lane half 0 of the depth-t output feeds the odd children,
            # lane half 1 feeds the even children.
            nodes = [nd["odd"] for nd in nodes] + [nd["even"] for nd in nodes]
    return packed


# ----------------------------------------------------------------------------
# Wrapper-side layout plumbing (undo the lane packing / recursive_zip)
# ----------------------------------------------------------------------------
def _depth_residues(depth):
    # residue (mod 2^depth) of original time indices handled by each packed node
    res = [0]
    for s in range(depth):
        res = [r + (1 << s) for r in res] + res
    return res


def _unscramble(out_t, depth, B, T, D):
    n = 1 << depth
    lh = T >> (depth + 1)
    arr = out_t.reshape(lh, 2, n, B, D)          # (q', [ou|eu], node, b, d)
    arr = jnp.flip(arr, axis=1)                  # -> ([eu|ou]) = time parity 0/1
    res = _depth_residues(depth)
    inv = [res.index(r) for r in range(n)]       # node axis -> residue order
    arr = jnp.take(arr, jnp.asarray(inv, dtype=jnp.int32), axis=2)
    return arr.reshape(T, B, D).transpose(1, 0, 2)   # (B, T, D), natural time order


# ----------------------------------------------------------------------------
# Forward wrapper: one pallas_call for the whole EncoderTree
# ----------------------------------------------------------------------------
@functools.partial(jax.jit, static_argnames=("num_levels", "kernel_size"))
def encoder_tree_forward(x, packed_weights, num_levels, kernel_size):
    B, T, D = x.shape
    assert T % (2 ** num_levels) == 0, (
        "fused kernel requires T divisible by 2**num_levels")
    pad_l, pad_r = _pads(kernel_size)
    # (B, T, D) -> (T, B*D): time on sublanes, batch*channels on lanes.
    x2 = x.astype(jnp.float32).transpose(1, 0, 2).reshape(T, B * D)
    out_shapes = tuple(
        jax.ShapeDtypeStruct((T >> (t + 1), (1 << (t + 1)) * B * D), jnp.float32)
        for t in range(num_levels))
    kernel = _build_encoder_tree_kernel(num_levels, kernel_size, pad_l, pad_r)
    outs = pl.pallas_call(
        kernel,
        out_shape=out_shapes,
        compiler_params=pltpu.CompilerParams(
            vmem_limit_bytes=32 * 1024 * 1024),
    )(x2, *packed_weights)
    # Module ordering: list_x[0] = deepest level, list_x[-1] = root level.
    results = []
    for lvl in range(num_levels):
        t = num_levels - 1 - lvl
        results.append(_unscramble(outs[t], t, B, T, D))
    return results


# ----------------------------------------------------------------------------
# Pure-JAX reference (no Pallas) mirroring the PyTorch module, for checking
# ----------------------------------------------------------------------------
def _ref_subnet(x, params, pad_l, pad_r):
    w1, b1, w2, b2 = params
    K_ = w1.shape[0]
    xp = jnp.concatenate(
        [jnp.repeat(x[:, :1], pad_l, axis=1), x,
         jnp.repeat(x[:, -1:], pad_r, axis=1)], axis=1)
    L1 = xp.shape[1] - K_ + 1
    h = sum(jnp.einsum("bld,df->blf", xp[:, k:k + L1], w1[k],
                       precision=jax.lax.Precision.HIGHEST)
            for k in range(K_)) + b1
    h = jnp.where(h >= 0, h, 0.01 * h)
    K2 = w2.shape[0]
    L2 = L1 - K2 + 1
    y = sum(jnp.einsum("blf,fo->blo", h[:, k:k + L2], w2[k],
                       precision=jax.lax.Precision.HIGHEST)
            for k in range(K2)) + b2
    return jnp.tanh(y)


def _ref_interactor(x, blk, pad_l, pad_r):
    xe = x[:, 0::2]
    xo = x[:, 1::2]
    d = xo * jnp.exp(_ref_subnet(xe, blk["phi"], pad_l, pad_r))
    c = xe * jnp.exp(_ref_subnet(xo, blk["psi"], pad_l, pad_r))
    return c + _ref_subnet(d, blk["U"], pad_l, pad_r), \
        d - _ref_subnet(c, blk["P"], pad_l, pad_r)


def _ref_zip(e, o):
    B_, m, D_ = e.shape
    return jnp.stack([e, o], axis=2).reshape(B_, 2 * m, D_)


def _ref_tree(x, node, level, pad_l, pad_r, outs):
    eu, ou = _ref_interactor(x, node["block"], pad_l, pad_r)
    z = _ref_zip(eu, ou)
    outs[level].append(z)
    if level == 0:
        return z
    er = _ref_tree(eu, node["even"], level - 1, pad_l, pad_r, outs)
    orr = _ref_tree(ou, node["odd"], level - 1, pad_l, pad_r, outs)
    return _ref_zip(er, orr)


def _ref_recursive_zip(items):
    if len(items) == 1:
        return items[0]
    if len(items) == 2:
        return _ref_zip(items[0], items[1])
    mid = len(items) // 2
    return _ref_zip(_ref_recursive_zip(items[:mid]),
                    _ref_recursive_zip(items[mid:]))


def encoder_tree_reference(x, tree_params, num_levels, kernel_size):
    pad_l, pad_r = _pads(kernel_size)
    outs = [[] for _ in range(num_levels)]
    _ref_tree(x.astype(jnp.float32), tree_params, num_levels - 1,
              pad_l, pad_r, outs)
    return [_ref_recursive_zip(o) for o in outs]


# ----------------------------------------------------------------------------
# Deterministic synthetic parameters (per tree node)
# ----------------------------------------------------------------------------
def init_interactor_params(key, in_planes, hidden, kernel_size):
    keys = jax.random.split(key, 16)
    params = {}
    idx = 0
    for name in ("phi", "psi", "U", "P"):
        w1 = 0.1 * jax.random.normal(keys[idx],
                                     (kernel_size, in_planes, hidden),
                                     jnp.float32)
        b1 = 0.1 * jax.random.normal(keys[idx + 1], (1, hidden), jnp.float32)
        w2 = 0.1 * jax.random.normal(keys[idx + 2], (3, hidden, in_planes),
                                     jnp.float32)
        b2 = 0.1 * jax.random.normal(keys[idx + 3], (1, in_planes),
                                     jnp.float32)
        params[name] = (w1, b1, w2, b2)
        idx += 4
    return params


def init_tree_params(key, level, in_planes, hidden, kernel_size):
    k1, k2, k3 = jax.random.split(key, 3)
    node = {"block": init_interactor_params(k1, in_planes, hidden, kernel_size)}
    if level != 0:
        node["even"] = init_tree_params(k2, level - 1, in_planes, hidden,
                                        kernel_size)
        node["odd"] = init_tree_params(k3, level - 1, in_planes, hidden,
                                       kernel_size)
    return node


# ----------------------------------------------------------------------------
if __name__ == "__main__":
    # EncoderTree(in_planes=8, num_levels=2, kernel_size=5, dropout=0.5,
    #             groups=1, hidden_size=1, INN=True)
    B, T, D = 2, 16, 8
    num_levels = 2
    kernel_size = 5
    hidden_size = 1
    H = int(D * hidden_size)

    key = jax.random.PRNGKey(0)
    k_x, k_p = jax.random.split(key)
    x = jax.random.normal(k_x, (B, T, D), jnp.float32)   # (batch, time, chan)
    tree_params = init_tree_params(k_p, num_levels - 1, D, H, kernel_size)

    # Pack/pair the weights once (outside the jitted hot path).
    packed_weights = pack_tree_weights(tree_params, num_levels, B)

    list_x = encoder_tree_forward(x, packed_weights,
                                  num_levels=num_levels,
                                  kernel_size=kernel_size)
    list_x = [jax.block_until_ready(o) for o in list_x]

    # Correctness check against a pure-JAX reference of the original module.
    ref = encoder_tree_reference(x, tree_params, num_levels, kernel_size)
    for got, want in zip(list_x, ref):
        assert got.shape == (B, T, D), got.shape
        assert bool(jnp.all(jnp.isfinite(got)))
        err = float(jnp.max(jnp.abs(got - want)))
        assert err < 5e-2, f"mismatch vs reference: max abs err = {err}"

    print("KERNEL_OK")
</pallas_src>

<mosaic_0001>
module attributes {stable_mosaic.version = 11 : i64} {
  func.func @kernel(%arg0: memref<16x16xf32, #tpu.memory_space<vmem>>, %arg1: memref<160x32xf32, #tpu.memory_space<vmem>>, %arg2: memref<1x32xf32, #tpu.memory_space<vmem>>, %arg3: memref<96x32xf32, #tpu.memory_space<vmem>>, %arg4: memref<1x32xf32, #tpu.memory_space<vmem>>, %arg5: memref<160x32xf32, #tpu.memory_space<vmem>>, %arg6: memref<1x32xf32, #tpu.memory_space<vmem>>, %arg7: memref<96x32xf32, #tpu.memory_space<vmem>>, %arg8: memref<1x32xf32, #tpu.memory_space<vmem>>, %arg9: memref<320x64xf32, #tpu.memory_space<vmem>>, %arg10: memref<1x64xf32, #tpu.memory_space<vmem>>, %arg11: memref<192x64xf32, #tpu.memory_space<vmem>>, %arg12: memref<1x64xf32, #tpu.memory_space<vmem>>, %arg13: memref<320x64xf32, #tpu.memory_space<vmem>>, %arg14: memref<1x64xf32, #tpu.memory_space<vmem>>, %arg15: memref<192x64xf32, #tpu.memory_space<vmem>>, %arg16: memref<1x64xf32, #tpu.memory_space<vmem>>, %arg17: memref<8x32xf32, #tpu.memory_space<vmem>>, %arg18: memref<4x64xf32, #tpu.memory_space<vmem>>) attributes {dimension_semantics = [], scalar_prefetch = 0 : i64, scratch_operands = 0 : i64, tpu.core_type = #tpu.core_type<tc>} {
    %c0 = arith.constant 0 : index
    %c0_0 = arith.constant 0 : index
    %0 = vector.load %arg0[%c0, %c0_0] : memref<16x16xf32, #tpu.memory_space<vmem>>, vector<16x16xf32>
    %1 = tpu.iota {dimensions = array<i32: 0>} : vector<8x16xi32>
    %2 = tpu.iota {dimensions = array<i32: 1>} : vector<8x16xi32>
    %c2_i32 = arith.constant 2 : i32
    %3 = vector.broadcast %c2_i32 : i32 to vector<8x16xi32>
    %4 = arith.muli %3, %1 : vector<8x16xi32>
    %c0_i32 = arith.constant 0 : i32
    %5 = vector.broadcast %c0_i32 : i32 to vector<8x16xi32>
    %6 = arith.addi %4, %5 : vector<8x16xi32>
    %7 = arith.cmpi eq, %2, %6 : vector<8x16xi32>
    %cst = arith.constant 1.000000e+00 : f32
    %cst_1 = arith.constant 0.000000e+00 : f32
    %8 = vector.broadcast %cst : f32 to vector<8x16xf32>
    %9 = vector.broadcast %cst_1 : f32 to vector<8x16xf32>
    %10 = arith.select %7, %8, %9 : vector<8x16xi1>, vector<8x16xf32>
    %11 = tpu.iota {dimensions = array<i32: 0>} : vector<8x16xi32>
    %12 = tpu.iota {dimensions = array<i32: 1>} : vector<8x16xi32>
    %c2_i32_2 = arith.constant 2 : i32
    %13 = vector.broadcast %c2_i32_2 : i32 to vector<8x16xi32>
    %14 = arith.muli %13, %11 : vector<8x16xi32>
    %c1_i32 = arith.constant 1 : i32
    %15 = vector.broadcast %c1_i32 : i32 to vector<8x16xi32>
    %16 = arith.addi %14, %15 : vector<8x16xi32>
    %17 = arith.cmpi eq, %12, %16 : vector<8x16xi32>
    %cst_3 = arith.constant 1.000000e+00 : f32
    %cst_4 = arith.constant 0.000000e+00 : f32
    %18 = vector.broadcast %cst_3 : f32 to vector<8x16xf32>
    %19 = vector.broadcast %cst_4 : f32 to vector<8x16xf32>
    %20 = arith.select %17, %18, %19 : vector<8x16xi1>, vector<8x16xf32>
    %cst_5 = arith.constant dense<0.000000e+00> : vector<8x16xf32>
    %21 = tpu.matmul %10, %0, %cst_5 {dimension_numbers = #tpu.dot_dimension_numbers<[1], [0], [0], [1], [0, 0, 1, 1], [], []>} : vector<8x16xf32>, vector<16x16xf32>, vector<8x16xf32> -> vector<8x16xf32>
    %cst_6 = arith.constant dense<0.000000e+00> : vector<8x16xf32>
    %22 = tpu.matmul %20, %0, %cst_6 {dimension_numbers = #tpu.dot_dimension_numbers<[1], [0], [0], [1], [0, 0, 1, 1], [], []>} : vector<8x16xf32>, vector<16x16xf32>, vector<8x16xf32> -> vector<8x16xf32>
    %23 = tpu.concatenate %21, %22 in 1 : vector<8x16xf32>, vector<8x16xf32> -> vector<8x32xf32>
    %24 = vector.extract_strided_slice %23 {offsets = [0, 0], sizes = [1, 32], strides = [1, 1]} : vector<8x32xf32> to vector<1x32xf32>
    %25 = vector.shape_cast %24 : vector<1x32xf32> to vector<1x32xf32>
    %26 = vector.broadcast %25 : vector<1x32xf32> to vector<3x32xf32>
    %27 = vector.extract_strided_slice %23 {offsets = [7, 0], sizes = [1, 32], strides = [1, 1]} : vector<8x32xf32> to vector<1x32xf32>
    %28 = vector.shape_cast %27 : vector<1x32xf32> to vector<1x32xf32>
    %29 = vector.broadcast %28 : vector<1x32xf32> to vector<3x32xf32>
    %30 = tpu.concatenate %26, %23, %29 in 0 : vector<3x32xf32>, vector<8x32xf32>, vector<3x32xf32> -> vector<14x32xf32>
    %31 = vector.extract_strided_slice %30 {offsets = [0, 0], sizes = [10, 32], strides = [1, 1]} : vector<14x32xf32> to vector<10x32xf32>
    %32 = vector.extract_strided_slice %30 {offsets = [1, 0], sizes = [10, 32], strides = [1, 1]} : vector<14x32xf32> to vector<10x32xf32>
    %33 = vector.extract_strided_slice %30 {offsets = [2, 0], sizes = [10, 32], strides = [1, 1]} : vector<14x32xf32> to vector<10x32xf32>
    %34 = vector.extract_strided_slice %30 {offsets = [3, 0], sizes = [10, 32], strides = [1, 1]} : vector<14x32xf32> to vector<10x32xf32>
    %35 = vector.extract_strided_slice %30 {offsets = [4, 0], sizes = [10, 32], strides = [1, 1]} : vector<14x32xf32> to vector<10x32xf32>
    %36 = tpu.concatenate %31, %32, %33, %34, %35 in 1 : vector<10x32xf32>, vector<10x32xf32>, vector<10x32xf32>, vector<10x32xf32>, vector<10x32xf32> -> vector<10x160xf32>
    %c0_7 = arith.constant 0 : index
    %c0_8 = arith.constant 0 : index
    %37 = vector.load %arg1[%c0_7, %c0_8] : memref<160x32xf32, #tpu.memory_space<vmem>>, vector<160x32xf32>
    %cst_9 = arith.constant dense<0.000000e+00> : vector<10x32xf32>
    %38 = tpu.matmul %36, %37, %cst_9 {dimension_numbers = #tpu.dot_dimension_numbers<[1], [0], [0], [1], [0, 0, 1, 1], [], []>} : vector<10x160xf32>, vector<160x32xf32>, vector<10x32xf32> -> vector<10x32xf32>
    %c0_10 = arith.constant 0 : index
    %c0_11 = arith.constant 0 : index
    %39 = vector.load %arg2[%c0_10, %c0_11] : memref<1x32xf32, #tpu.memory_space<vmem>>, vector<1x32xf32>
    %40 = vector.broadcast %39 : vector<1x32xf32> to vector<10x32xf32>
    %41 = arith.addf %38, %40 : vector<10x32xf32>
    %cst_12 = arith.constant 0.000000e+00 : f32
    %42 = vector.broadcast %cst_12 : f32 to vector<10x32xf32>
    %43 = arith.cmpf oge, %41, %42 : vector<10x32xf32>
    %cst_13 = arith.constant 0.00999999977 : f32
    %44 = vector.broadcast %cst_13 : f32 to vector<10x32xf32>
    %45 = arith.mulf %44, %41 : vector<10x32xf32>
    %46 = arith.select %43, %41, %45 : vector<10x32xi1>, vector<10x32xf32>
    %47 = vector.extract_strided_slice %46 {offsets = [0, 0], sizes = [8, 32], strides = [1, 1]} : vector<10x32xf32> to vector<8x32xf32>
    %48 = vector.extract_strided_slice %46 {offsets = [1, 0], sizes = [8, 32], strides = [1, 1]} : vector<10x32xf32> to vector<8x32xf32>
    %49 = vector.extract_strided_slice %46 {offsets = [2, 0], sizes = [8, 32], strides = [1, 1]} : vector<10x32xf32> to vector<8x32xf32>
    %50 = tpu.concatenate %47, %48, %49 in 1 : vector<8x32xf32>, vector<8x32xf32>, vector<8x32xf32> -> vector<8x96xf32>
    %c0_14 = arith.constant 0 : index
    %c0_15 = arith.constant 0 : index
    %51 = vector.load %arg3[%c0_14, %c0_15] : memref<96x32xf32, #tpu.memory_space<vmem>>, vector<96x32xf32>
    %cst_16 = arith.constant dense<0.000000e+00> : vector<8x32xf32>
    %52 = tpu.matmul %50, %51, %cst_16 {dimension_numbers = #tpu.dot_dimension_numbers<[1], [0], [0], [1], [0, 0, 1, 1], [], []>} : vector<8x96xf32>, vector<96x32xf32>, vector<8x32xf32> -> vector<8x32xf32>
    %c0_17 = arith.constant 0 : index
    %c0_18 = arith.constant 0 : index
    %53 = vector.load %arg4[%c0_17, %c0_18] : memref<1x32xf32, #tpu.memory_space<vmem>>, vector<1x32xf32>
    %54 = vector.broadcast %53 : vector<1x32xf32> to vector<8x32xf32>
    %55 = arith.addf %52, %54 : vector<8x32xf32>
    %56 = math.tanh %55 : vector<8x32xf32>
    %57 = tpu.concatenate %22, %21 in 1 : vector<8x16xf32>, vector<8x16xf32> -> vector<8x32xf32>
    %58 = math.exp %56 : vector<8x32xf32>
    %59 = arith.mulf %57, %58 : vector<8x32xf32>
    %60 = vector.extract_strided_slice %59 {offsets = [0, 0], sizes = [1, 32], strides = [1, 1]} : vector<8x32xf32> to vector<1x32xf32>
    %61 = vector.shape_cast %60 : vector<1x32xf32> to vector<1x32xf32>
    %62 = vector.broadcast %61 : vector<1x32xf32> to vector<3x32xf32>
    %63 = vector.extract_strided_slice %59 {offsets = [7, 0], sizes = [1, 32], strides = [1, 1]} : vector<8x32xf32> to vector<1x32xf32>
    %64 = vector.shape_cast %63 : vector<1x32xf32> to vector<1x32xf32>
    %65 = vector.broadcast %64 : vector<1x32xf32> to vector<3x32xf32>
    %66 = tpu.concatenate %62, %59, %65 in 0 : vector<3x32xf32>, vector<8x32xf32>, vector<3x32xf32> -> vector<14x32xf32>
    %67 = vector.extract_strided_slice %66 {offsets = [0, 0], sizes = [10, 32], strides = [1, 1]} : vector<14x32xf32> to vector<10x32xf32>
    %68 = vector.extract_strided_slice %66 {offsets = [1, 0], sizes = [10, 32], strides = [1, 1]} : vector<14x32xf32> to vector<10x32xf32>
    %69 = vector.extract_strided_slice %66 {offsets = [2, 0], sizes = [10, 32], strides = [1, 1]} : vector<14x32xf32> to vector<10x32xf32>
    %70 = vector.extract_strided_slice %66 {offsets = [3, 0], sizes = [10, 32], strides = [1, 1]} : vector<14x32xf32> to vector<10x32xf32>
    %71 = vector.extract_strided_slice %66 {offsets = [4, 0], sizes = [10, 32], strides = [1, 1]} : vector<14x32xf32> to vector<10x32xf32>
    %72 = tpu.concatenate %67, %68, %69, %70, %71 in 1 : vector<10x32xf32>, vector<10x32xf32>, vector<10x32xf32>, vector<10x32xf32>, vector<10x32xf32> -> vector<10x160xf32>
    %c0_19 = arith.constant 0 : index
    %c0_20 = arith.constant 0 : index
    %73 = vector.load %arg5[%c0_19, %c0_20] : memref<160x32xf32, #tpu.memory_space<vmem>>, vector<160x32xf32>
    %cst_21 = arith.constant dense<0.000000e+00> : vector<10x32xf32>
    %74 = tpu.matmul %72, %73, %cst_21 {dimension_numbers = #tpu.dot_dimension_numbers<[1], [0], [0], [1], [0, 0, 1, 1], [], []>} : vector<10x160xf32>, vector<160x32xf32>, vector<10x32xf32> -> vector<10x32xf32>
    %c0_22 = arith.constant 0 : index
    %c0_23 = arith.constant 0 : index
    %75 = vector.load %arg6[%c0_22, %c0_23] : memref<1x32xf32, #tpu.memory_space<vmem>>, vector<1x32xf32>
    %76 = vector.broadcast %75 : vector<1x32xf32> to vector<10x32xf32>
    %77 = arith.addf %74, %76 : vector<10x32xf32>
    %cst_24 = arith.constant 0.000000e+00 : f32
    %78 = vector.broadcast %cst_24 : f32 to vector<10x32xf32>
    %79 = arith.cmpf oge, %77, %78 : vector<10x32xf32>
    %cst_25 = arith.constant 0.00999999977 : f32
    %80 = vector.broadcast %cst_25 : f32 to vector<10x32xf32>
    %81 = arith.mulf %80, %77 : vector<10x32xf32>
    %82 = arith.select %79, %77, %81 : vector<10x32xi1>, vector<10x32xf32>
    %83 = vector.extract_strided_slice %82 {offsets = [0, 0], sizes = [8, 32], strides = [1, 1]} : vector<10x32xf32> to vector<8x32xf32>
    %84 = vector.extract_strided_slice %82 {offsets = [1, 0], sizes = [8, 32], strides = [1, 1]} : vector<10x32xf32> to vector<8x32xf32>
    %85 = vector.extract_strided_slice %82 {offsets = [2, 0], sizes = [8, 32], strides = [1, 1]} : vector<10x32xf32> to vector<8x32xf32>
    %86 = tpu.concatenate %83, %84, %85 in 1 : vector<8x32xf32>, vector<8x32xf32>, vector<8x32xf32> -> vector<8x96xf32>
    %c0_26 = arith.constant 0 : index
    %c0_27 = arith.constant 0 : index
    %87 = vector.load %arg7[%c0_26, %c0_27] : memref<96x32xf32, #tpu.memory_space<vmem>>, vector<96x32xf32>
    %cst_28 = arith.constant dense<0.000000e+00> : vector<8x32xf32>
    %88 = tpu.matmul %86, %87, %cst_28 {dimension_numbers = #tpu.dot_dimension_numbers<[1], [0], [0], [1], [0, 0, 1, 1], [], []>} : vector<8x96xf32>, vector<96x32xf32>, vector<8x32xf32> -> vector<8x32xf32>
    %c0_29 = arith.constant 0 : index
    %c0_30 = arith.constant 0 : index
    %89 = vector.load %arg8[%c0_29, %c0_30] : memref<1x32xf32, #tpu.memory_space<vmem>>, vector<1x32xf32>
    %90 = vector.broadcast %89 : vector<1x32xf32> to vector<8x32xf32>
    %91 = arith.addf %88, %90 : vector<8x32xf32>
    %92 = math.tanh %91 : vector<8x32xf32>
    %93 = arith.addf %59, %92 : vector<8x32xf32>
    %c0_31 = arith.constant 0 : index
    %c0_32 = arith.constant 0 : index
    %94 = vector.load %arg17[%c0_31, %c0_32] : memref<8x32xf32, #tpu.memory_space<vmem>>, vector<8x32xf32>
    tpu.vector_store %arg17[%c0_31, %c0_32], %93 {strides = array<i32>} : memref<8x32xf32, #tpu.memory_space<vmem>>, vector<8x32xf32>,
    %95 = tpu.iota {dimensions = array<i32: 0>} : vector<4x8xi32>
    %96 = tpu.iota {dimensions = array<i32: 1>} : vector<4x8xi32>
    %c2_i32_33 = arith.constant 2 : i32
    %97 = vector.broadcast %c2_i32_33 : i32 to vector<4x8xi32>
    %98 = arith.muli %97, %95 : vector<4x8xi32>
    %c0_i32_34 = arith.constant 0 : i32
    %99 = vector.broadcast %c0_i32_34 : i32 to vector<4x8xi32>
    %100 = arith.addi %98, %99 : vector<4x8xi32>
    %101 = arith.cmpi eq, %96, %100 : vector<4x8xi32>
    %cst_35 = arith.constant 1.000000e+00 : f32
    %cst_36 = arith.constant 0.000000e+00 : f32
    %102 = vector.broadcast %cst_35 : f32 to vector<4x8xf32>
    %103 = vector.broadcast %cst_36 : f32 to vector<4x8xf32>
    %104 = arith.select %101, %102, %103 : vector<4x8xi1>, vector<4x8xf32>
    %105 = tpu.iota {dimensions = array<i32: 0>} : vector<4x8xi32>
    %106 = tpu.iota {dimensions = array<i32: 1>} : vector<4x8xi32>
    %c2_i32_37 = arith.constant 2 : i32
    %107 = vector.broadcast %c2_i32_37 : i32 to vector<4x8xi32>
    %108 = arith.muli %107, %105 : vector<4x8xi32>
    %c1_i32_38 = arith.constant 1 : i32
    %109 = vector.broadcast %c1_i32_38 : i32 to vector<4x8xi32>
    %110 = arith.addi %108, %109 : vector<4x8xi32>
    %111 = arith.cmpi eq, %106, %110 : vector<4x8xi32>
    %cst_39 = arith.constant 1.000000e+00 : f32
    %cst_40 = arith.constant 0.000000e+00 : f32
    %112 = vector.broadcast %cst_39 : f32 to vector<4x8xf32>
    %113 = vector.broadcast %cst_40 : f32 to vector<4x8xf32>
    %114 = arith.select %111, %112, %113 : vector<4x8xi1>, vector<4x8xf32>
    %cst_41 = arith.constant dense<0.000000e+00> : vector<4x32xf32>
    %115 = tpu.matmul %104, %93, %cst_41 {dimension_numbers = #tpu.dot_dimension_numbers<[1], [0], [0], [1], [0, 0, 1, 1], [], []>} : vector<4x8xf32>, vector<8x32xf32>, vector<4x32xf32> -> vector<4x32xf32>
    %cst_42 = arith.constant dense<0.000000e+00> : vector<4x32xf32>
    %116 = tpu.matmul %114, %93, %cst_42 {dimension_numbers = #tpu.dot_dimension_numbers<[1], [0], [0], [1], [0, 0, 1, 1], [], []>} : vector<4x8xf32>, vector<8x32xf32>, vector<4x32xf32> -> vector<4x32xf32>
    %117 = tpu.concatenate %115, %116 in 1 : vector<4x32xf32>, vector<4x32xf32> -> vector<4x64xf32>
    %118 = vector.extract_strided_slice %117 {offsets = [0, 0], sizes = [1, 64], strides = [1, 1]} : vector<4x64xf32> to vector<1x64xf32>
    %119 = vector.shape_cast %118 : vector<1x64xf32> to vector<1x64xf32>
    %120 = vector.broadcast %119 : vector<1x64xf32> to vector<3x64xf32>
    %121 = vector.extract_strided_slice %117 {offsets = [3, 0], sizes = [1, 64], strides = [1, 1]} : vector<4x64xf32> to vector<1x64xf32>
    %122 = vector.shape_cast %121 : vector<1x64xf32> to vector<1x64xf32>
    %123 = vector.broadcast %122 : vector<1x64xf32> to vector<3x64xf32>
    %124 = tpu.concatenate %120, %117, %123 in 0 : vector<3x64xf32>, vector<4x64xf32>, vector<3x64xf32> -> vector<10x64xf32>
    %125 = vector.extract_strided_slice %124 {offsets = [0, 0], sizes = [6, 64], strides = [1, 1]} : vector<10x64xf32> to vector<6x64xf32>
    %126 = vector.extract_strided_slice %124 {offsets = [1, 0], sizes = [6, 64], strides = [1, 1]} : vector<10x64xf32> to vector<6x64xf32>
    %127 = vector.extract_strided_slice %124 {offsets = [2, 0], sizes = [6, 64], strides = [1, 1]} : vector<10x64xf32> to vector<6x64xf32>
    %128 = vector.extract_strided_slice %124 {offsets = [3, 0], sizes = [6, 64], strides = [1, 1]} : vector<10x64xf32> to vector<6x64xf32>
    %129 = vector.extract_strided_slice %124 {offsets = [4, 0], sizes = [6, 64], strides = [1, 1]} : vector<10x64xf32> to vector<6x64xf32>
    %130 = tpu.concatenate %125, %126, %127, %128, %129 in 1 : vector<6x64xf32>, vector<6x64xf32>, vector<6x64xf32>, vector<6x64xf32>, vector<6x64xf32> -> vector<6x320xf32>
    %c0_43 = arith.constant 0 : index
    %c0_44 = arith.constant 0 : index
    %131 = vector.load %arg9[%c0_43, %c0_44] : memref<320x64xf32, #tpu.memory_space<vmem>>, vector<320x64xf32>
    %cst_45 = arith.constant dense<0.000000e+00> : vector<6x64xf32>
    %132 = tpu.matmul %130, %131, %cst_45 {dimension_numbers = #tpu.dot_dimension_numbers<[1], [0], [0], [1], [0, 0, 1, 1], [], []>} : vector<6x320xf32>, vector<320x64xf32>, vector<6x64xf32> -> vector<6x64xf32>
    %c0_46 = arith.constant 0 : index
    %c0_47 = arith.constant 0 : index
    %133 = vector.load %arg10[%c0_46, %c0_47] : memref<1x64xf32, #tpu.memory_space<vmem>>, vector<1x64xf32>
    %134 = vector.broadcast %133 : vector<1x64xf32> to vector<6x64xf32>
    %135 = arith.addf %132, %134 : vector<6x64xf32>
    %cst_48 = arith.constant 0.000000e+00 : f32
    %136 = vector.broadcast %cst_48 : f32 to vector<6x64xf32>
    %137 = arith.cmpf oge, %135, %136 : vector<6x64xf32>
    %cst_49 = arith.constant 0.00999999977 : f32
    %138 = vector.broadcast %cst_49 : f32 to vector<6x64xf32>
    %139 = arith.mulf %138, %135 : vector<6x64xf32>
    %140 = arith.select %137, %135, %139 : vector<6x64xi1>, vector<6x64xf32>
    %141 = vector.extract_strided_slice %140 {offsets = [0, 0], sizes = [4, 64], strides = [1, 1]} : vector<6x64xf32> to vector<4x64xf32>
    %142 = vector.extract_strided_slice %140 {offsets = [1, 0], sizes = [4, 64], strides = [1, 1]} : vector<6x64xf32> to vector<4x64xf32>
    %143 = vector.extract_strided_slice %140 {offsets = [2, 0], sizes = [4, 64], strides = [1, 1]} : vector<6x64xf32> to vector<4x64xf32>
    %144 = tpu.concatenate %141, %142, %143 in 1 : vector<4x64xf32>, vector<4x64xf32>, vector<4x64xf32> -> vector<4x192xf32>
    %c0_50 = arith.constant 0 : index
    %c0_51 = arith.constant 0 : index
    %145 = vector.load %arg11[%c0_50, %c0_51] : memref<192x64xf32, #tpu.memory_space<vmem>>, vector<192x64xf32>
    %cst_52 = arith.constant dense<0.000000e+00> : vector<4x64xf32>
    %146 = tpu.matmul %144, %145, %cst_52 {dimension_numbers = #tpu.dot_dimension_numbers<[1], [0], [0], [1], [0, 0, 1, 1], [], []>} : vector<4x192xf32>, vector<192x64xf32>, vector<4x64xf32> -> vector<4x64xf32>
    %c0_53 = arith.constant 0 : index
    %c0_54 = arith.constant 0 : index
    %147 = vector.load %arg12[%c0_53, %c0_54] : memref<1x64xf32, #tpu.memory_space<vmem>>, vector<1x64xf32>
    %148 = vector.broadcast %147 : vector<1x64xf32> to vector<4x64xf32>
    %149 = arith.addf %146, %148 : vector<4x64xf32>
    %150 = math.tanh %149 : vector<4x64xf32>
    %151 = tpu.concatenate %116, %115 in 1 : vector<4x32xf32>, vector<4x32xf32> -> vector<4x64xf32>
    %152 = math.exp %150 : vector<4x64xf32>
    %153 = arith.mulf %151, %152 : vector<4x64xf32>
    %154 = vector.extract_strided_slice %153 {offsets = [0, 0], sizes = [1, 64], strides = [1, 1]} : vector<4x64xf32> to vector<1x64xf32>
    %155 = vector.shape_cast %154 : vector<1x64xf32> to vector<1x64xf32>
    %156 = vector.broadcast %155 : vector<1x64xf32> to vector<3x64xf32>
    %157 = vector.extract_strided_slice %153 {offsets = [3, 0], sizes = [1, 64], strides = [1, 1]} : vector<4x64xf32> to vector<1x64xf32>
    %158 = vector.shape_cast %157 : vector<1x64xf32> to vector<1x64xf32>
    %159 = vector.broadcast %158 : vector<1x64xf32> to vector<3x64xf32>
    %160 = tpu.concatenate %156, %153, %159 in 0 : vector<3x64xf32>, vector<4x64xf32>, vector<3x64xf32> -> vector<10x64xf32>
    %161 = vector.extract_strided_slice %160 {offsets = [0, 0], sizes = [6, 64], strides = [1, 1]} : vector<10x64xf32> to vector<6x64xf32>
    %162 = vector.extract_strided_slice %160 {offsets = [1, 0], sizes = [6, 64], strides = [1, 1]} : vector<10x64xf32> to vector<6x64xf32>
    %163 = vector.extract_strided_slice %160 {offsets = [2, 0], sizes = [6, 64], strides = [1, 1]} : vector<10x64xf32> to vector<6x64xf32>
    %164 = vector.extract_strided_slice %160 {offsets = [3, 0], sizes = [6, 64], strides = [1, 1]} : vector<10x64xf32> to vector<6x64xf32>
    %165 = vector.extract_strided_slice %160 {offsets = [4, 0], sizes = [6, 64], strides = [1, 1]} : vector<10x64xf32> to vector<6x64xf32>
    %166 = tpu.concatenate %161, %162, %163, %164, %165 in 1 : vector<6x64xf32>, vector<6x64xf32>, vector<6x64xf32>, vector<6x64xf32>, vector<6x64xf32> -> vector<6x320xf32>
    %c0_55 = arith.constant 0 : index
    %c0_56 = arith.constant 0 : index
    %167 = vector.load %arg13[%c0_55, %c0_56] : memref<320x64xf32, #tpu.memory_space<vmem>>, vector<320x64xf32>
    %cst_57 = arith.constant dense<0.000000e+00> : vector<6x64xf32>
    %168 = tpu.matmul %166, %167, %cst_57 {dimension_numbers = #tpu.dot_dimension_numbers<[1], [0], [0], [1], [0, 0, 1, 1], [], []>} : vector<6x320xf32>, vector<320x64xf32>, vector<6x64xf32> -> vector<6x64xf32>
    %c0_58 = arith.constant 0 : index
    %c0_59 = arith.constant 0 : index
    %169 = vector.load %arg14[%c0_58, %c0_59] : memref<1x64xf32, #tpu.memory_space<vmem>>, vector<1x64xf32>
    %170 = vector.broadcast %169 : vector<1x64xf32> to vector<6x64xf32>
    %171 = arith.addf %168, %170 : vector<6x64xf32>
    %cst_60 = arith.constant 0.000000e+00 : f32
    %172 = vector.broadcast %cst_60 : f32 to vector<6x64xf32>
    %173 = arith.cmpf oge, %171, %172 : vector<6x64xf32>
    %cst_61 = arith.constant 0.00999999977 : f32
    %174 = vector.broadcast %cst_61 : f32 to vector<6x64xf32>
    %175 = arith.mulf %174, %171 : vector<6x64xf32>
    %176 = arith.select %173, %171, %175 : vector<6x64xi1>, vector<6x64xf32>
    %177 = vector.extract_strided_slice %176 {offsets = [0, 0], sizes = [4, 64], strides = [1, 1]} : vector<6x64xf32> to vector<4x64xf32>
    %178 = vector.extract_strided_slice %176 {offsets = [1, 0], sizes = [4, 64], strides = [1, 1]} : vector<6x64xf32> to vector<4x64xf32>
    %179 = vector.extract_strided_slice %176 {offsets = [2, 0], sizes = [4, 64], strides = [1, 1]} : vector<6x64xf32> to vector<4x64xf32>
    %180 = tpu.concatenate %177, %178, %179 in 1 : vector<4x64xf32>, vector<4x64xf32>, vector<4x64xf32> -> vector<4x192xf32>
    %c0_62 = arith.constant 0 : index
    %c0_63 = arith.constant 0 : index
    %181 = vector.load %arg15[%c0_62, %c0_63] : memref<192x64xf32, #tpu.memory_space<vmem>>, vector<192x64xf32>
    %cst_64 = arith.constant dense<0.000000e+00> : vector<4x64xf32>
    %182 = tpu.matmul %180, %181, %cst_64 {dimension_numbers = #tpu.dot_dimension_numbers<[1], [0], [0], [1], [0, 0, 1, 1], [], []>} : vector<4x192xf32>, vector<192x64xf32>, vector<4x64xf32> -> vector<4x64xf32>
    %c0_65 = arith.constant 0 : index
    %c0_66 = arith.constant 0 : index
    %183 = vector.load %arg16[%c0_65, %c0_66] : memref<1x64xf32, #tpu.memory_space<vmem>>, vector<1x64xf32>
    %184 = vector.broadcast %183 : vector<1x64xf32> to vector<4x64xf32>
    %185 = arith.addf %182, %184 : vector<4x64xf32>
    %186 = math.tanh %185 : vector<4x64xf32>
    %187 = arith.addf %153, %186 : vector<4x64xf32>
    %c0_67 = arith.constant 0 : index
    %c0_68 = arith.constant 0 : index
    %188 = vector.load %arg18[%c0_67, %c0_68] : memref<4x64xf32, #tpu.memory_space<vmem>>, vector<4x64xf32>
    tpu.vector_store %arg18[%c0_67, %c0_68], %187 {strides = array<i32>} : memref<4x64xf32, #tpu.memory_space<vmem>>, vector<4x64xf32>,
    return
  }
}

</mosaic_0001>

<bundles_post_ra>
// kernel: encoder_tree_forward.1
= control target key start
LH: loop header
LB: loop body
LE: loop exit
PB: predicated region body
PF: predicated region fallthrough
CT: control target
= control target key end

     0   :  { %v60_v0 = vlaneseq  ;;  %v2176_v1 = vmov 0.0|0.0   ;;  %vm2177_vm0 = vmmov 0   ;;  %v2178_v4 = vmov 0.0   ;;  %s2179_s19 = smov 16   ;;  %s2181_s20 = smov 32   ;;  %s3122_s0 = inlined_call_operand.vmem [shape: f32[16,16], index: 0, kind: input, shape index: {}]   ;;  %s3123_s1 = inlined_call_operand.vmem [shape: f32[160,32], index: 1, kind: input, shape index: {}]   ;;  %s3124_s3 = inlined_call_operand.vmem [shape: f32[96,32], index: 3, kind: input, shape index: {}]   ;;  %s3125_s2 = inlined_call_operand.vmem [shape: f32[1,32], index: 2, kind: input, shape index: {}]   ;;  %s3126_s5 = inlined_call_operand.vmem [shape: f32[160,32], index: 5, kind: input, shape index: {}]   ;;  %s3127_s4 = inlined_call_operand.vmem [shape: f32[1,32], index: 4, kind: input, shape index: {}]   ;;  %s3128_s7 = inlined_call_operand.vmem [shape: f32[96,32], index: 7, kind: input, shape index: {}]   ;;  %s3129_s6 = inlined_call_operand.vmem [shape: f32[1,32], index: 6, kind: input, shape index: {}]   ;;  %s3130_s8 = inlined_call_operand.vmem [shape: f32[1,32], index: 8, kind: input, shape index: {}]   ;;  %s3131_s17 = inlined_call_operand.vmem [shape: f32[8,32], index: 17, kind: output, shape index: {0}]   ;;  %s3132_s9 = inlined_call_operand.vmem [shape: f32[320,64], index: 9, kind: input, shape index: {}]   ;;  %s3133_s11 = inlined_call_operand.vmem [shape: f32[192,64], index: 11, kind: input, shape index: {}]   ;;  %s3134_s10 = inlined_call_operand.vmem [shape: f32[1,64], index: 10, kind: input, shape index: {}]   ;;  %s3135_s13 = inlined_call_operand.vmem [shape: f32[320,64], index: 13, kind: input, shape index: {}]   ;;  %s3136_s12 = inlined_call_operand.vmem [shape: f32[1,64], index: 12, kind: input, shape index: {}]   ;;  %s3137_s15 = inlined_call_operand.vmem [shape: f32[192,64], index: 15, kind: input, shape index: {}]   ;;  %s3138_s14 = inlined_call_operand.vmem [shape: f32[1,64], index: 14, kind: input, shape index: {}]   ;;  %s3139_s16 = inlined_call_operand.vmem [shape: f32[1,64], index: 16, kind: input, shape index: {}]   ;;  %s3140_s18 = inlined_call_operand.vmem [shape: f32[4,64], index: 18, kind: output, shape index: {1}]  }
   0x1   :  { %3144 = sst [smem:[#allocation2_spill]] %s3122_s0  ;;  %1888 = vmatprep.subr.bf16.mxu1 %v2176_v1  ;;  %1780 = vmatprep.mubr.msk.f32.mxu1 %vm2177_vm0, %v2178_v4  ;;  %vm70_vm2 = vcmask 130048   ;;  %vm233_vm4 = vcmask 1042432   ;;  %vm268_vm5 = vcmask 1043456   ;;  %vm248_vm6 = vcmask 1045504   ;;  %s2182_s22 = smov 96  }
   0x2   :  { %3145 = sst [smem:[#allocation3_spill]] %s3123_s1  ;;  %s3147_s29 = sld [smem:[#allocation2_spill]]  ;;  %v2287_v6 = vshrl.u32 %v60_v0, 7  ;;  %1885 = vmatprep.subr.bf16.mxu0 %v2176_v1  ;;  %1773 = vmatprep.mubr.msk.f32.mxu0 %vm2177_vm0, %v2178_v4  ;;  %v63_v7 = vand.u32 127, %v60_v0  ;;  %vm272_vm7 = vcmask 261120   ;;  %vm238_vm8 = vcmask 1046528  }
   0x3   :  { %3146 = sst [smem:[#allocation4_spill]] %s3124_s3  ;;  %s3148_s21 = sld [smem:[#allocation3_spill]]  ;;  %vm258_vm9 = vcmask 1044480   ;;  %vm275_vm10 = vcmask 523264   ;;  %vm278_vm11 = vcmask 785408  }
   0x4   :  { %v64_v8 = vmul.u32 2, %v2287_v6  ;;  %v2383_v46 = vsub.s32 0, %v2287_v6  ;;  %v228_v47 = vsub.s32 7, %v2287_v6  ;;  %s3149_s24 = sld [smem:[#allocation4_spill]] }
   0x6   :  { %v67_v9 = vadd.s32 1, %v64_v8  ;;  %vm65_vm1 = vcmp.eq.s32.totalorder %v63_v7, %v64_v8 }
   0x7   :  { %v2296_v10 = vsel %vm65_vm1, 1.0, %v2178_v4  ;;  %vm784_vm1 = vcmask 64512  }
   0x8   :  { %v58_v2 = vld [vmem:[%s3147_s29] sm:$0xff]  ;;  %v59_v3 = vld [vmem:[%s3147_s29 + $0x8] sm:$0xff]  ;;  %vm68_vm3 = vcmp.eq.s32.totalorder %v63_v7, %v67_v9 }
   0x9   :  { %v1886_v5 = vpack.c.bf16 %v59_v3, %v58_v2  ;;  %v2301_v11 = vsel %vm68_vm3, 1.0, %v2178_v4  ;;  %v281_v16 = vld [vmem:[%s3148_s21] sm:$0xff]  ;;  %v282_v17 = vld [vmem:[%s3148_s21 + $0x8] sm:$0xff]  ;;  %v283_v18 = vld [vmem:[%s3148_s21 + $0x10] sm:$0xff]  ;;  %vm1613_vm3 = vcmask 519168  }
   0xa   :  { %v1892_v19 = vpack.c.bf16 %v282_v17, %v281_v16  ;;  %v284_v20 = vld [vmem:[%s3148_s21 + $0x18] sm:$0xff]  ;;  %v285_v22 = vld [vmem:[%s3148_s21 + $0x20] sm:$0xff]  ;;  %v286_v23 = vld [vmem:[%s3148_s21 + $0x28] sm:$0xff] }
   0xb   :  { %1890 = vmatpush3.bf16.msra.mxu1 %v1886_v5  ;;  %1887 = vmatpush3.bf16.msra.mxu0 %v1886_v5  ;;  %v1895_v21 = vpack.c.bf16 %v284_v20, %v283_v18  ;;  %v1898_v24 = vpack.c.bf16 %v286_v23, %v285_v22  ;;  %v287_v25 = vld [vmem:[%s3148_s21 + $0x30] sm:$0xff]  ;;  %v288_v26 = vld [vmem:[%s3148_s21 + $0x38] sm:$0xff]  ;;  %v289_v28 = vld [vmem:[%s3148_s21 + $0x40] sm:$0xff] }
   0xc   :  { %1891 = vmatprep.subr.bf16.mxu0 %v2176_v1  ;;  %1921 = vmatprep.subr.bf16.mxu1 %v2176_v1  ;;  %v1901_v27 = vpack.c.bf16 %v288_v26, %v287_v25  ;;  %v290_v29 = vld [vmem:[%s3148_s21 + $0x48] sm:$0xff]  ;;  %v291_v31 = vld [vmem:[%s3148_s21 + $0x50] sm:$0xff]  ;;  %v292_v32 = vld [vmem:[%s3148_s21 + $0x58] sm:$0xff] }
   0xd   :  { %v1904_v30 = vpack.c.bf16 %v290_v29, %v289_v28  ;;  %v1907_v33 = vpack.c.bf16 %v292_v32, %v291_v31  ;;  %v293_v34 = vld [vmem:[%s3148_s21 + $0x60] sm:$0xff]  ;;  %v294_v35 = vld [vmem:[%s3148_s21 + $0x68] sm:$0xff]  ;;  %v295_v37 = vld [vmem:[%s3148_s21 + $0x70] sm:$0xff] }
   0xe   :  { %1774 = vmatmul.mubr.msk.f32.vlgmr.msra.gmra.mrb[0].mxu0 %vm70_vm2, %v2296_v10  ;;  %1781 = vmatmul.mubr.msk.f32.vlgmr.msra.gmra.mrb[0].mxu1 %vm70_vm2, %v2301_v11  ;;  %v1910_v36 = vpack.c.bf16 %v294_v35, %v293_v34  ;;  %v296_v38 = vld [vmem:[%s3148_s21 + $0x78] sm:$0xff]  ;;  %v297_v40 = vld [vmem:[%s3148_s21 + $0x80] sm:$0xff]  ;;  %v298_v41 = vld [vmem:[%s3148_s21 + $0x88] sm:$0xff] }
   0xf   :  { %1807 = vmatprep.mubr.msk.f32.mxu1 %vm2177_vm0, %v2178_v4  ;;  %1893 = vmatpush1.bf16.msra.mxu0 %v1892_v19  ;;  %v1913_v39 = vpack.c.bf16 %v296_v38, %v295_v37  ;;  %v1916_v42 = vpack.c.bf16 %v298_v41, %v297_v40  ;;  %v299_v43 = vld [vmem:[%s3148_s21 + $0x90] sm:$0xff]  ;;  %v300_v44 = vld [vmem:[%s3148_s21 + $0x98] sm:$0xff]  ;;  %s2180_s21 = smov 64   ;;  %v409_v22 = vld [vmem:[%s3149_s24] sm:$0xff] }
  0x10   :  { %1894 = vmatprep.subr.bf16.mxu0 %v2176_v1  ;;  %v1919_v45 = vpack.c.bf16 %v300_v44, %v299_v43  ;;  %v410_v23 = vld [vmem:[%s3149_s24 + $0x8] sm:$0xff]  ;;  %v412_v26 = vld [vmem:[%s3149_s24 + $0x18] sm:$0xff]  ;;  %v413_v28 = vld [vmem:[%s3149_s24 + $0x20] sm:$0xff] }
  0x11   :  { %v1922_v25 = vpack.c.bf16 %v410_v23, %v409_v22  ;;  %v414_v29 = vld [vmem:[%s3149_s24 + $0x28] sm:$0xff]  ;;  %v415_v31 = vld [vmem:[%s3149_s24 + $0x30] sm:$0xff]  ;;  %v416_v32 = vld [vmem:[%s3149_s24 + $0x38] sm:$0xff] }
  0x12   :  { %v417_v34 = vld [vmem:[%s3149_s24 + $0x40] sm:$0xff]  ;;  %v418_v35 = vld [vmem:[%s3149_s24 + $0x48] sm:$0xff]  ;;  %v419_v37 = vld [vmem:[%s3149_s24 + $0x50] sm:$0xff] }
  0x13   :  { %1896 = vmatpush1.bf16.msra.mxu0 %v1895_v21  ;;  %1923 = vmatpush3.bf16.msra.mxu1 %v1922_v25  ;;  %v420_v38 = vld [vmem:[%s3149_s24 + $0x58] sm:$0xff]  ;;  %v1625_v40 = vld [vmem:[%s3125_s2] ss:$0 sm:$0xff] }
  0x14   :  { %1897 = vmatprep.subr.bf16.mxu0 %v2176_v1  ;;  %1924 = vmatprep.subr.bf16.mxu1 %v2176_v1  ;;  %v573_v23 = vld [vmem:[%s3126_s5 + $0x60] sm:$0xff] }
  0x17   :  { %1899 = vmatpush1.bf16.msra.mxu0 %v1898_v24  ;;  %v411_v24 = vld [vmem:[%s3149_s24 + $0x10] sm:$0xff] }
  0x18   :  { %1900 = vmatprep.subr.bf16.mxu0 %v2176_v1 }
  0x1b   :  { %1902 = vmatpush1.bf16.msra.mxu0 %v1901_v27  ;;  %v1925_v27 = vpack.c.bf16 %v412_v26, %v411_v24  ;;  %v574_v24 = vld [vmem:[%s3126_s5 + $0x68] sm:$0xff]  ;;  %v575_v26 = vld [vmem:[%s3126_s5 + $0x70] sm:$0xff] }
  0x1c   :  { %1903 = vmatprep.subr.bf16.mxu0 %v2176_v1  ;;  %v1958_v25 = vpack.c.bf16 %v574_v24, %v573_v23  ;;  %v694_v23 = vld [vmem:[%s3128_s7 + $0x28] sm:$0xff] }
  0x1d   :  { %1926 = vmatpush3.bf16.msra.mxu1 %v1925_v27  ;;  %v576_v27 = vld [vmem:[%s3126_s5 + $0x78] sm:$0xff] }
  0x1e   :  { %1927 = vmatprep.subr.bf16.mxu1 %v2176_v1 }
  0x1f   :  { %1905 = vmatpush1.bf16.msra.mxu0 %v1904_v30  ;;  %v1928_v30 = vpack.c.bf16 %v414_v29, %v413_v28  ;;  %v1961_v28 = vpack.c.bf16 %v576_v27, %v575_v26  ;;  %v577_v29 = vld [vmem:[%s3126_s5 + $0x80] sm:$0xff]  ;;  %v696_v26 = vld [vmem:[%s3128_s7 + $0x38] sm:$0xff] }
  0x20   :  { %1906 = vmatprep.subr.bf16.mxu0 %v2176_v1 }
  0x21   :  { %1929 = vmatpush3.bf16.msra.mxu1 %v1928_v30  ;;  %v578_v30 = vld [vmem:[%s3126_s5 + $0x88] sm:$0xff] }
  0x22   :  { %1930 = vmatprep.subr.bf16.mxu1 %v2176_v1 }
  0x23   :  { %1908 = vmatpush1.bf16.msra.mxu0 %v1907_v33  ;;  %v1931_v33 = vpack.c.bf16 %v416_v32, %v415_v31  ;;  %v1964_v31 = vpack.c.bf16 %v578_v30, %v577_v29  ;;  %v1628_v32 = vld [vmem:[%s3127_s4] ss:$0 sm:$0xff]  ;;  %v698_v29 = vld [vmem:[%s3128_s7 + $0x48] sm:$0xff] }
  0x24   :  { %1909 = vmatprep.subr.bf16.mxu0 %v2176_v1 }
  0x25   :  { %1932 = vmatpush3.bf16.msra.mxu1 %v1931_v33 }
  0x26   :  { %1933 = vmatprep.subr.bf16.mxu1 %v2176_v1 }
  0x27   :  { %1911 = vmatpush1.bf16.msra.mxu0 %v1910_v36  ;;  %v1934_v36 = vpack.c.bf16 %v418_v35, %v417_v34 }
  0x28   :  { %1912 = vmatprep.subr.bf16.mxu0 %v2176_v1 }
  0x29   :  { %1935 = vmatpush3.bf16.msra.mxu1 %v1934_v36 }
  0x2a   :  { %1936 = vmatprep.subr.bf16.mxu1 %v2176_v1 }
  0x2b   :  { %1914 = vmatpush1.bf16.msra.mxu0 %v1913_v39  ;;  %v1937_v39 = vpack.c.bf16 %v420_v38, %v419_v37  ;;  %v579_v38 = vld [vmem:[%s3126_s5 + $0x90] sm:$0xff] }
  0x2c   :  { %1915 = vmatprep.subr.bf16.mxu0 %v2176_v1 }
  0x2d   :  { %1938 = vmatpush3.bf16.msra.mxu1 %v1937_v39  ;;  %v580_v39 = vld [vmem:[%s3126_s5 + $0x98] sm:$0xff] }
  0x2e   :  { %1939 = vmatprep.subr.bf16.mxu1 %v2176_v1 }
  0x2f   :  { %1917 = vmatpush1.bf16.msra.mxu0 %v1916_v42 }
  0x30   :  { %1918 = vmatprep.subr.bf16.mxu0 %v2176_v1 }
  0x33   :  { %1920 = vmatpush1.bf16.msra.mxu0 %v1919_v45 }
  0x34   :  { %1837 = vmatprep.subr.mxu0 %v2178_v4 }
  0xe1   :  { %v2307_v12 = vpop.f32.mrb[0].mxu0  ;;  %v2309_v14 = vpop.f32.mrb[0].mxu1 }
  0xe2   :  { %v1775_v13 = vpop.f32.mrb[1].mxu0  ;;  %218 = vrot.lane.b32.xlu0 %v2309_v14, %s2179_s19  ;;  %v1782_v15 = vpop.f32.mrb[1].mxu1 }
 0x154   :  { %v219_v48 = vpop.permute.xlu0 %218 }
 0x155   :  { %v221_v49 = vsel %vm70_vm2, %v2307_v12, %v219_v48 }
 0x156   :  { %v225_v50 = vrot.slane %v221_v49, %v2383_v46  ;;  %v229_v51 = vrot.slane %v221_v49, %v228_v47  ;;  %v231_v52 = vrot.slane %v221_v49, 5 }
 0x158   :  { %v234_v53 = vsel %vm233_vm4, %v225_v50, %v231_v52  ;;  %v235_v54 = vsel %vm233_vm4, %v231_v52, %v229_v51 }
 0x159   :  { %v269_v55 = vrot.slane %v234_v53, 4  ;;  %v270_v56 = vrot.slane %v235_v54, 4  ;;  %v249_v57 = vrot.slane %v234_v53, 2  ;;  %v250_v58 = vrot.slane %v235_v54, 2 }
 0x15a   :  { %v239_v59 = vrot.slane %v234_v53, 1  ;;  %v240_v60 = vrot.slane %v235_v54, 1  ;;  %v259_v63 = vrot.slane %v234_v53, 3  ;;  %v260_v0 = vrot.slane %v235_v54, 3 }
 0x15b   :  { %v271_v61 = vsel %vm268_vm5, %v269_v55, %v270_v56  ;;  %v251_v62 = vsel %vm248_vm6, %v249_v57, %v250_v58 }
 0x15c   :  { %1626 = vmatprep.mubr.msk.f32.mxu0 %vm272_vm7, %v271_v61  ;;  %252 = vrot.lane.b32.xlu1 %v251_v62, %s2180_s21  ;;  %v241_v2 = vsel %vm238_vm8, %v239_v59, %v240_v60  ;;  %v261_v3 = vsel %vm258_vm9, %v259_v63, %v260_v0  ;;  %v561_v63 = vld [vmem:[%s3126_s5] sm:$0xff] }
 0x15d   :  { %242 = vrot.lane.b32.xlu0 %v241_v2, %s2181_s20 }
 0x160   :  { %262 = vrot.lane.b32.xlu1 %v261_v3, %s2182_s22  ;;  %v564_v3 = vld [vmem:[%s3126_s5 + $0x18] sm:$0xff] }
 0x161   :  { %244 = vrot.lane.b32.xlu0 %v240_v60, %s2181_s20 }
 0x164   :  { %254 = vrot.lane.b32.xlu1 %v250_v58, %s2180_s21 }
 0x165   :  { %264 = vrot.lane.b32.xlu0 %v260_v0, %s2182_s22  ;;  %v562_v0 = vld [vmem:[%s3126_s5 + $0x8] sm:$0xff] }
 0x166   :  { %v1940_v2 = vpack.c.bf16 %v562_v0, %v561_v63 }
 0x1ce   :  { %v253_v5 = vpop.permute.xlu1 %252 }
 0x1cf   :  { %v243_v7 = vpop.permute.xlu0 %242 }
 0x1d0   :  { %v273_v8 = vsel %vm272_vm7, %v234_v53, %v243_v7  ;;  %v565_v7 = vld [vmem:[%s3126_s5 + $0x20] sm:$0xff] }
 0x1d1   :  { %v276_v13 = vsel %vm275_vm10, %v273_v8, %v253_v5  ;;  %v566_v8 = vld [vmem:[%s3126_s5 + $0x28] sm:$0xff] }
 0x1d2   :  { %v263_v9 = vpop.permute.xlu1 %262 }
 0x1d3   :  { %v279_v15 = vsel %vm278_vm11, %v276_v13, %v263_v9  ;;  %v245_v16 = vpop.permute.xlu0 %244  ;;  %v1946_v9 = vpack.c.bf16 %v566_v8, %v565_v7  ;;  %v567_v13 = vld [vmem:[%s3126_s5 + $0x30] sm:$0xff] }
 0x1d4   :  { %377 = vmatmul.mubr.f32.vlgmr.msra.gmra.mrb[2].mxu0 %v279_v15  ;;  %v274_v17 = vsel %vm272_vm7, %v235_v54, %v245_v16  ;;  %v568_v15 = vld [vmem:[%s3126_s5 + $0x38] sm:$0xff] }
 0x1d5   :  { %1627 = vmatprep.mubr.msk.f32.mxu0 %vm272_vm7, %v270_v56  ;;  %v1949_v16 = vpack.c.bf16 %v568_v15, %v567_v13 }
 0x1d6   :  { %v255_v18 = vpop.permute.xlu1 %254 }
 0x1d7   :  { %v277_v19 = vsel %vm275_vm10, %v274_v17, %v255_v18  ;;  %v265_v20 = vpop.permute.xlu0 %264  ;;  %v569_v17 = vld [vmem:[%s3126_s5 + $0x40] sm:$0xff]  ;;  %v570_v18 = vld [vmem:[%s3126_s5 + $0x48] sm:$0xff] }
 0x1d8   :  { %v280_v21 = vsel %vm278_vm11, %v277_v19, %v265_v20  ;;  %v1952_v19 = vpack.c.bf16 %v570_v18, %v569_v17  ;;  %v571_v20 = vld [vmem:[%s3126_s5 + $0x50] sm:$0xff]  ;;  %v690_v17 = vld [vmem:[%s3128_s7 + $0x8] sm:$0xff] }
 0x1d9   :  { %382 = vmatmul.mubr.f32.gmra.mrb[4].mxu0 %v280_v21  ;;  %v572_v21 = vld [vmem:[%s3126_s5 + $0x58] sm:$0xff]  ;;  %v691_v18 = vld [vmem:[%s3128_s7 + $0x10] sm:$0xff] }
 0x1da   :  { %1839 = vmatprep.mubr.msk.f32.mxu0 %vm2177_vm0, %v2178_v4  ;;  %v1955_v22 = vpack.c.bf16 %v572_v21, %v571_v20  ;;  %v692_v20 = vld [vmem:[%s3128_s7 + $0x18] sm:$0xff] }
 0x1db   :  { %v1973_v21 = vpack.c.bf16 %v692_v20, %v691_v18  ;;  %v983_v18 = vld [vmem:[%s3132_s9 + $0x88] sm:$0xff] }
 0x2a7   :  { %v378_v41 = vpop.f32.mrb[2].mxu0 }
 0x2a8   :  { %v379_v42 = vadd.f32 %v1625_v40, %v378_v41  ;;  %v380_v43 = vpop.f32.mrb[3].mxu0  ;;  %v1967_v41 = vpack.c.bf16 %v580_v39, %v579_v38 }
 0x2aa   :  { %v389_v44 = vmul.f32 0.01, %v379_v42  ;;  %vm387_vm12 = vcmp.ge.f32.partialorder %v379_v42, 0.0 }
 0x2ac   :  { %v383_v45 = vpop.f32.mrb[4].mxu0  ;;  %v391_v50 = vsel %vm387_vm12, %v379_v42, %v389_v44 }
 0x2ad   :  { %v384_v48 = vadd.f32 %v1625_v40, %v383_v45  ;;  %v385_v49 = vpop.f32.mrb[5].mxu0  ;;  %v401_v55 = vrot.slane %v391_v50, 2  ;;  %v395_v56 = vrot.slane %v391_v50, 1 }
 0x2af   :  { %vm388_vm13 = vcmp.ge.f32.partialorder %v384_v48, 0.0  ;;  %v390_v51 = vmul.f32 0.01, %v384_v48 }
 0x2b1   :  { %v392_v52 = vsel %vm388_vm13, %v384_v48, %v390_v51 }
 0x2b2   :  { %v396_v53 = vrot.slane %v392_v52, 1  ;;  %v402_v54 = vrot.slane %v392_v52, 2 }
 0x2b4   :  { %v403_v57 = vsel %vm248_vm6, %v401_v55, %v402_v54  ;;  %v397_v58 = vsel %vm238_vm8, %v395_v56, %v396_v53 }
 0x2b5   :  { %404 = vrot.lane.b32.xlu0 %v403_v57, %s2180_s21  ;;  %398 = vrot.lane.b32.xlu1 %v397_v58, %s2181_s20 }
 0x2b9   :  { %503 = vrot.lane.b32.xlu1 %v2307_v12, %s2179_s19  ;;  %v563_v12 = vld [vmem:[%s3126_s5 + $0x10] sm:$0xff] }
 0x2ba   :  { %v1943_v5 = vpack.c.bf16 %v564_v3, %v563_v12 }
 0x327   :  { %v405_v59 = vpop.permute.xlu0 %404  ;;  %v399_v60 = vpop.permute.xlu1 %398 }
 0x328   :  { %v407_v61 = vsel %vm272_vm7, %v391_v50, %v399_v60 }
 0x329   :  { %v408_v62 = vsel %vm275_vm10, %v407_v61, %v405_v59 }
 0x32a   :  { %1808 = vmatmul.mubr.msk.f32.vlgmr.msra.gmra.mrb[2].mxu1 %vm278_vm11, %v408_v62 }
 0x32b   :  { %1941 = vmatpush1.bf16.msra.mxu1 %v1940_v2  ;;  %v504_v40 = vpop.permute.xlu1 %503 }
 0x32c   :  { %1942 = vmatprep.subr.bf16.mxu1 %v2176_v1  ;;  %v506_v43 = vsel %vm70_vm2, %v2309_v14, %v504_v40 }
 0x32f   :  { %1944 = vmatpush1.bf16.msra.mxu1 %v1943_v5 }
 0x330   :  { %1945 = vmatprep.subr.bf16.mxu1 %v2176_v1 }
 0x333   :  { %1947 = vmatpush1.bf16.msra.mxu1 %v1946_v9 }
 0x334   :  { %1948 = vmatprep.subr.bf16.mxu1 %v2176_v1 }
 0x337   :  { %1950 = vmatpush1.bf16.msra.mxu1 %v1949_v16  ;;  %v689_v16 = vld [vmem:[%s3128_s7] sm:$0xff] }
 0x338   :  { %1951 = vmatprep.subr.bf16.mxu1 %v2176_v1 }
 0x33b   :  { %1953 = vmatpush1.bf16.msra.mxu1 %v1952_v19  ;;  %v1970_v19 = vpack.c.bf16 %v690_v17, %v689_v16  ;;  %v982_v17 = vld [vmem:[%s3132_s9 + $0x80] sm:$0xff] }
 0x33c   :  { %1954 = vmatprep.subr.bf16.mxu1 %v2176_v1  ;;  %v1987_v20 = vpack.c.bf16 %v983_v18, %v982_v17 }
 0x33f   :  { %1956 = vmatpush1.bf16.msra.mxu1 %v1955_v22  ;;  %v693_v22 = vld [vmem:[%s3128_s7 + $0x20] sm:$0xff] }
 0x340   :  { %1957 = vmatprep.subr.bf16.mxu1 %v2176_v1  ;;  %v1976_v24 = vpack.c.bf16 %v694_v23, %v693_v22  ;;  %v984_v22 = vld [vmem:[%s3132_s9 + $0x90] sm:$0xff]  ;;  %v985_v23 = vld [vmem:[%s3132_s9 + $0x98] sm:$0xff] }
 0x343   :  { %1959 = vmatpush1.bf16.msra.mxu1 %v1958_v25  ;;  %v695_v25 = vld [vmem:[%s3128_s7 + $0x30] sm:$0xff] }
 0x344   :  { %1960 = vmatprep.subr.bf16.mxu1 %v2176_v1  ;;  %v1979_v27 = vpack.c.bf16 %v696_v26, %v695_v25  ;;  %v1991_v25 = vpack.c.bf16 %v985_v23, %v984_v22  ;;  %v968_v26 = vld [vmem:[%s3132_s9 + $0x10] sm:$0xff] }
 0x347   :  { %1962 = vmatpush1.bf16.msra.mxu1 %v1961_v28  ;;  %v697_v28 = vld [vmem:[%s3128_s7 + $0x40] sm:$0xff] }
 0x348   :  { %1963 = vmatprep.subr.bf16.mxu1 %v2176_v1  ;;  %v1982_v30 = vpack.c.bf16 %v698_v29, %v697_v28  ;;  %v986_v28 = vld [vmem:[%s3132_s9 + $0xa0] sm:$0xff]  ;;  %v987_v29 = vld [vmem:[%s3132_s9 + $0xa8] sm:$0xff] }
 0x34b   :  { %1965 = vmatpush1.bf16.msra.mxu1 %v1964_v31  ;;  %v699_v31 = vld [vmem:[%s3128_s7 + $0x50] sm:$0xff] }
 0x34c   :  { %1966 = vmatprep.subr.bf16.mxu1 %v2176_v1 }
 0x34f   :  { %1968 = vmatpush1.bf16.msra.mxu1 %v1967_v41 }
 0x350   :  { %1969 = vmatprep.subr.bf16.mxu1 %v2176_v1 }
 0x3fd   :  { %v497_v33 = vpop.f32.mrb[2].mxu1 }
 0x3fe   :  { %v498_v34 = vadd.f32 %v1628_v32, %v497_v33  ;;  %v1809_v35 = vpop.f32.mrb[3].mxu1  ;;  %v700_v32 = vld [vmem:[%s3128_s7 + $0x58] sm:$0xff] }
 0x3ff   :  { %v1985_v33 = vpack.c.bf16 %v700_v32, %v699_v31  ;;  %v1995_v31 = vpack.c.bf16 %v987_v29, %v986_v28  ;;  %v970_v32 = vld [vmem:[%s3132_s9 + $0x20] sm:$0xff] }
 0x400   :  { %2164 = vtanh.f32 %v498_v34  ;;  %v1630_v34 = vld [vmem:[%s3129_s6] ss:$0 sm:$0xff] }
 0x40a   :  { %v2165_v36 = vpop.eup %2164 }
 0x40b   :  { %v507_v37 = vmul.f32 1.442695, %v2165_v36 }
 0x40d   :  { %2166 = vpow2.f32 %v507_v37 }
 0x417   :  { %v2167_v42 = vpop.eup %2166 }
 0x418   :  { %v2543_v44 = vmul.f32 %v2167_v42, %v506_v43 }
 0x41a   :  { %v513_v45 = vrot.slane %v2543_v44, %v2383_v46  ;;  %v517_v48 = vrot.slane %v2543_v44, %v228_v47  ;;  %v519_v49 = vrot.slane %v2543_v44, 5 }
 0x41c   :  { %v521_v50 = vsel %vm233_vm4, %v513_v45, %v519_v49  ;;  %v522_v51 = vsel %vm233_vm4, %v519_v49, %v517_v48 }
 0x41d   :  { %v552_v52 = vrot.slane %v521_v50, 4  ;;  %v553_v53 = vrot.slane %v522_v51, 4  ;;  %v534_v14 = vrot.slane %v521_v50, 2  ;;  %v535_v54 = vrot.slane %v522_v51, 2 }
 0x41e   :  { %v525_v55 = vrot.slane %v521_v50, 1  ;;  %v526_v56 = vrot.slane %v522_v51, 1  ;;  %v543_v59 = vrot.slane %v521_v50, 3  ;;  %v544_v60 = vrot.slane %v522_v51, 3 }
 0x41f   :  { %v554_v57 = vsel %vm268_vm5, %v552_v52, %v553_v53  ;;  %v536_v58 = vsel %vm248_vm6, %v534_v14, %v535_v54 }
 0x420   :  { %1631 = vmatprep.mubr.msk.f32.mxu1 %vm272_vm7, %v554_v57  ;;  %537 = vrot.lane.b32.xlu1 %v536_v58, %s2180_s21  ;;  %v527_v47 = vsel %vm238_vm8, %v525_v55, %v526_v56  ;;  %v545_v61 = vsel %vm258_vm9, %v543_v59, %v544_v60  ;;  %v1633_v57 = vld [vmem:[%s3130_s8] ss:$0 sm:$0xff] }
 0x421   :  { %528 = vrot.lane.b32.xlu0 %v527_v47, %s2181_s20 }
 0x424   :  { %530 = vrot.lane.b32.xlu1 %v526_v56, %s2181_s20 }
 0x425   :  { %546 = vrot.lane.b32.xlu0 %v545_v61, %s2182_s22 }
 0x428   :  { %548 = vrot.lane.b32.xlu1 %v544_v60, %s2182_s22 }
 0x429   :  { %539 = vrot.lane.b32.xlu0 %v535_v54, %s2180_s21 }
 0x492   :  { %v538_v62 = vpop.permute.xlu1 %537 }
 0x493   :  { %v529_v63 = vpop.permute.xlu0 %528 }
 0x494   :  { %v555_v0 = vsel %vm272_vm7, %v521_v50, %v529_v63 }
 0x495   :  { %v557_v2 = vsel %vm275_vm10, %v555_v0, %v538_v62  ;;  %v1000_v62 = vld [vmem:[%s3132_s9 + $0x110] sm:$0xff] }
 0x496   :  { %v531_v12 = vpop.permute.xlu1 %530 }
 0x497   :  { %v547_v3 = vpop.permute.xlu0 %546  ;;  %v556_v8 = vsel %vm272_vm7, %v522_v51, %v531_v12  ;;  %v1002_v12 = vld [vmem:[%s3132_s9 + $0x120] sm:$0xff] }
 0x498   :  { %v559_v5 = vsel %vm278_vm11, %v557_v2, %v547_v3  ;;  %v1003_v2 = vld [vmem:[%s3132_s9 + $0x128] sm:$0xff] }
 0x499   :  { %657 = vmatmul.mubr.f32.vlgmr.msra.gmra.mrb[4].mxu1 %v559_v5  ;;  %v2026_v3 = vpack.c.bf16 %v1003_v2, %v1002_v12  ;;  %v1004_v5 = vld [vmem:[%s3132_s9 + $0x130] sm:$0xff] }
 0x49a   :  { %1632 = vmatprep.mubr.msk.f32.mxu1 %vm272_vm7, %v553_v53  ;;  %v549_v7 = vpop.permute.xlu1 %548  ;;  %1971 = vmatpush3.bf16.msra.mxu1 %v1970_v19  ;;  %v966_v19 = vld [vmem:[%s3132_s9] sm:$0xff] }
 0x49b   :  { %v540_v9 = vpop.permute.xlu0 %539  ;;  %1972 = vmatprep.subr.bf16.mxu1 %v2176_v1 }
 0x49c   :  { %v558_v13 = vsel %vm275_vm10, %v556_v8, %v540_v9 }
 0x49d   :  { %v560_v15 = vsel %vm278_vm11, %v558_v13, %v549_v7  ;;  %v1005_v7 = vld [vmem:[%s3132_s9 + $0x138] sm:$0xff] }
 0x49e   :  { %662 = vmatmul.mubr.f32.gmra.mrb[6].mxu1 %v560_v15  ;;  %v2029_v8 = vpack.c.bf16 %v1005_v7, %v1004_v5 }
 0x49f   :  { %1834 = vmatprep.mubr.msk.f32.mxu1 %vm2177_vm0, %v2178_v4  ;;  %1974 = vmatpush3.bf16.msra.mxu1 %v1973_v21  ;;  %v967_v21 = vld [vmem:[%s3132_s9 + $0x8] sm:$0xff] }
 0x4a0   :  { %1975 = vmatprep.subr.bf16.mxu1 %v2176_v1 }
 0x4a3   :  { %1977 = vmatpush3.bf16.msra.mxu1 %v1976_v24  ;;  %v1989_v24 = vpack.c.bf16 %v967_v21, %v966_v19 }
 0x4a4   :  { %1978 = vmatprep.subr.bf16.mxu1 %v2176_v1 }
 0x4a7   :  { %1980 = vmatpush3.bf16.msra.mxu1 %v1979_v27  ;;  %v969_v27 = vld [vmem:[%s3132_s9 + $0x18] sm:$0xff] }
 0x4a8   :  { %1981 = vmatprep.subr.bf16.mxu1 %v2176_v1 }
 0x4ab   :  { %1983 = vmatpush3.bf16.msra.mxu1 %v1982_v30  ;;  %v1993_v30 = vpack.c.bf16 %v969_v27, %v968_v26 }
 0x4ac   :  { %1984 = vmatprep.subr.bf16.mxu1 %v2176_v1 }
 0x4af   :  { %1986 = vmatpush3.bf16.msra.mxu1 %v1985_v33  ;;  %v971_v33 = vld [vmem:[%s3132_s9 + $0x28] sm:$0xff] }
 0x4b0   :  { %1988 = vmatprep.subr.bf16.mxu1 %v1987_v20 }
 0x56c   :  { %v658_v35 = vpop.f32.mrb[4].mxu1 }
 0x56d   :  { %v659_v36 = vadd.f32 %v1630_v34, %v658_v35  ;;  %v660_v37 = vpop.f32.mrb[5].mxu1  ;;  %v989_v35 = vld [vmem:[%s3132_s9 + $0xb8] sm:$0xff] }
 0x56f   :  { %v669_v38 = vmul.f32 0.01, %v659_v36  ;;  %vm667_vm14 = vcmp.ge.f32.partialorder %v659_v36, 0.0 }
 0x571   :  { %v663_v39 = vpop.f32.mrb[6].mxu1  ;;  %v671_v42 = vsel %vm667_vm14, %v659_v36, %v669_v38  ;;  %v1997_v36 = vpack.c.bf16 %v971_v33, %v970_v32  ;;  %v972_v38 = vld [vmem:[%s3132_s9 + $0x30] sm:$0xff] }
 0x572   :  { %v664_v40 = vadd.f32 %v1630_v34, %v663_v39  ;;  %v665_v41 = vpop.f32.mrb[7].mxu1  ;;  %v681_v50 = vrot.slane %v671_v42, 2  ;;  %v675_v51 = vrot.slane %v671_v42, 1  ;;  %v988_v34 = vld [vmem:[%s3132_s9 + $0xb0] sm:$0xff]  ;;  %v973_v39 = vld [vmem:[%s3132_s9 + $0x38] sm:$0xff] }
 0x573   :  { %v1999_v37 = vpack.c.bf16 %v989_v35, %v988_v34  ;;  %v991_v41 = vld [vmem:[%s3132_s9 + $0xc8] sm:$0xff]  ;;  %v1167_v32 = vld [vmem:[%s3133_s11 + $0x10] sm:$0xff]  ;;  %v1168_v34 = vld [vmem:[%s3133_s11 + $0x18] sm:$0xff] }
 0x574   :  { %vm668_vm15 = vcmp.ge.f32.partialorder %v664_v40, 0.0  ;;  %v670_v43 = vmul.f32 0.01, %v664_v40  ;;  %v2035_v35 = vpack.c.bf16 %v1168_v34, %v1167_v32  ;;  %v1330_v32 = vld [vmem:[%s3135_s13 + $0xa8] sm:$0xff] }
 0x576   :  { %v672_v45 = vsel %vm668_vm15, %v664_v40, %v670_v43  ;;  %v990_v40 = vld [vmem:[%s3132_s9 + $0xc0] sm:$0xff] }
 0x577   :  { %v676_v48 = vrot.slane %v672_v45, 1  ;;  %v682_v49 = vrot.slane %v672_v45, 2  ;;  %v2003_v43 = vpack.c.bf16 %v991_v41, %v990_v40  ;;  %v974_v45 = vld [vmem:[%s3132_s9 + $0x40] sm:$0xff]  ;;  %v1172_v40 = vld [vmem:[%s3133_s11 + $0x38] sm:$0xff] }
 0x579   :  { %v683_v52 = vsel %vm248_vm6, %v681_v50, %v682_v49  ;;  %v677_v53 = vsel %vm238_vm8, %v675_v51, %v676_v48  ;;  %v975_v48 = vld [vmem:[%s3132_s9 + $0x48] sm:$0xff]  ;;  %v992_v49 = vld [vmem:[%s3132_s9 + $0xd0] sm:$0xff]  ;;  %v993_v50 = vld [vmem:[%s3132_s9 + $0xd8] sm:$0xff] }
 0x57a   :  { %684 = vrot.lane.b32.xlu1 %v683_v52, %s2180_s21  ;;  %678 = vrot.lane.b32.xlu0 %v677_v53, %s2181_s20  ;;  %v2005_v51 = vpack.c.bf16 %v975_v48, %v974_v45  ;;  %v2007_v52 = vpack.c.bf16 %v993_v50, %v992_v49  ;;  %v976_v53 = vld [vmem:[%s3132_s9 + $0x50] sm:$0xff]  ;;  %v1176_v49 = vld [vmem:[%s3133_s11 + $0x58] sm:$0xff] }
 0x57b   :  { %v1175_v48 = vld [vmem:[%s3133_s11 + $0x50] sm:$0xff] }
 0x57c   :  { %v2047_v50 = vpack.c.bf16 %v1176_v49, %v1175_v48 }
 0x5ec   :  { %v685_v14 = vpop.permute.xlu1 %684  ;;  %v679_v54 = vpop.permute.xlu0 %678 }
 0x5ed   :  { %v687_v55 = vsel %vm272_vm7, %v671_v42, %v679_v54  ;;  %v2001_v42 = vpack.c.bf16 %v973_v39, %v972_v38  ;;  %v994_v54 = vld [vmem:[%s3132_s9 + $0xe0] sm:$0xff]  ;;  %v1171_v39 = vld [vmem:[%s3133_s11 + $0x30] sm:$0xff] }
 0x5ee   :  { %v688_v56 = vsel %vm275_vm10, %v687_v55, %v685_v14  ;;  %v977_v14 = vld [vmem:[%s3132_s9 + $0x58] sm:$0xff]  ;;  %v995_v55 = vld [vmem:[%s3132_s9 + $0xe8] sm:$0xff]  ;;  %v2041_v41 = vpack.c.bf16 %v1172_v40, %v1171_v39 }
 0x5ef   :  { %1835 = vmatmul.mubr.msk.f32.vlgmr.msra.gmra.mrb[8].mxu1 %vm278_vm11, %v688_v56  ;;  %v2009_v56 = vpack.c.bf16 %v977_v14, %v976_v53  ;;  %v1179_v14 = vld [vmem:[%s3133_s11 + $0x70] sm:$0xff] }
 0x5f0   :  { %1990 = vmatpush3.bf16.msra.mxu1 %v1989_v24 }
 0x5f1   :  { %1992 = vmatprep.subr.bf16.mxu1 %v1991_v25 }
 0x5f4   :  { %1994 = vmatpush3.bf16.msra.mxu1 %v1993_v30 }
 0x5f5   :  { %1996 = vmatprep.subr.bf16.mxu1 %v1995_v31  ;;  %v1165_v31 = vld [vmem:[%s3133_s11] sm:$0xff] }
 0x5f8   :  { %1998 = vmatpush3.bf16.msra.mxu1 %v1997_v36  ;;  %v1169_v36 = vld [vmem:[%s3133_s11 + $0x20] sm:$0xff] }
 0x5f9   :  { %2000 = vmatprep.subr.bf16.mxu1 %v1999_v37  ;;  %v1170_v37 = vld [vmem:[%s3133_s11 + $0x28] sm:$0xff] }
 0x5fa   :  { %v2038_v38 = vpack.c.bf16 %v1170_v37, %v1169_v36  ;;  %v1314_v36 = vld [vmem:[%s3135_s13 + $0x28] sm:$0xff]  ;;  %v1331_v37 = vld [vmem:[%s3135_s13 + $0xb0] sm:$0xff] }
 0x5fc   :  { %2002 = vmatpush3.bf16.msra.mxu1 %v2001_v42  ;;  %v1173_v42 = vld [vmem:[%s3133_s11 + $0x40] sm:$0xff] }
 0x5fd   :  { %2004 = vmatprep.subr.bf16.mxu1 %v2003_v43  ;;  %v1174_v43 = vld [vmem:[%s3133_s11 + $0x48] sm:$0xff] }
 0x5fe   :  { %v2044_v45 = vpack.c.bf16 %v1174_v43, %v1173_v42  ;;  %v1316_v42 = vld [vmem:[%s3135_s13 + $0x38] sm:$0xff]  ;;  %v1333_v43 = vld [vmem:[%s3135_s13 + $0xc0] sm:$0xff] }
 0x600   :  { %2006 = vmatpush3.bf16.msra.mxu1 %v2005_v51  ;;  %v1177_v51 = vld [vmem:[%s3133_s11 + $0x60] sm:$0xff] }
 0x601   :  { %2008 = vmatprep.subr.bf16.mxu1 %v2007_v52  ;;  %v1178_v52 = vld [vmem:[%s3133_s11 + $0x68] sm:$0xff] }
 0x602   :  { %v2050_v53 = vpack.c.bf16 %v1178_v52, %v1177_v51  ;;  %v1318_v51 = vld [vmem:[%s3135_s13 + $0x48] sm:$0xff]  ;;  %v1335_v52 = vld [vmem:[%s3135_s13 + $0xd0] sm:$0xff] }
 0x604   :  { %2010 = vmatpush3.bf16.msra.mxu1 %v2009_v56  ;;  %v1181_v56 = vld [vmem:[%s3133_s11 + $0x80] sm:$0xff] }
 0x6c2   :  { %v777_v58 = vpop.f32.mrb[8].mxu1 }
 0x6c3   :  { %v778_v47 = vadd.f32 %v1633_v57, %v777_v58  ;;  %v1836_v59 = vpop.f32.mrb[9].mxu1  ;;  %v2011_v57 = vpack.c.bf16 %v995_v55, %v994_v54  ;;  %v978_v58 = vld [vmem:[%s3132_s9 + $0x60] sm:$0xff]  ;;  %v1180_v54 = vld [vmem:[%s3133_s11 + $0x78] sm:$0xff] }
 0x6c4   :  { %v2053_v55 = vpack.c.bf16 %v1180_v54, %v1179_v14 }
 0x6c5   :  { %2168 = vtanh.f32 %v778_v47  ;;  %v979_v47 = vld [vmem:[%s3132_s9 + $0x68] sm:$0xff]  ;;  %2012 = vmatprep.subr.bf16.mxu1 %v2011_v57 }
 0x6c6   :  { %v2013_v59 = vpack.c.bf16 %v979_v47, %v978_v58  ;;  %v1182_v57 = vld [vmem:[%s3133_s11 + $0x88] sm:$0xff]  ;;  %v1183_v47 = vld [vmem:[%s3133_s11 + $0x90] sm:$0xff] }
 0x6c7   :  { %v2056_v58 = vpack.c.bf16 %v1182_v57, %v1181_v56  ;;  %v1320_v56 = vld [vmem:[%s3135_s13 + $0x58] sm:$0xff]  ;;  %v1337_v57 = vld [vmem:[%s3135_s13 + $0xe0] sm:$0xff] }
 0x6c8   :  { %2014 = vmatpush3.bf16.msra.mxu1 %v2013_v59  ;;  %v1184_v59 = vld [vmem:[%s3133_s11 + $0x98] sm:$0xff] }
 0x6cf   :  { %v2169_v60 = vpop.eup %2168 }
 0x6d0   :  { %v782_v61 = vadd.f32 %v2169_v60, %v2543_v44  ;;  %v998_v44 = vld [vmem:[%s3132_s9 + $0x100] sm:$0xff]  ;;  %v996_v60 = vld [vmem:[%s3132_s9 + $0xf0] sm:$0xff] }
 0x6d2   :  { %783 = vst.msk [vmem:[%s3131_s17] sm:$0xff] %vm272_vm7, %v782_v61  ;;  %1838 = vmatpush3.msra.mxu0 %v782_v61 }
 0x6d3   :  { %1840 = vmatmul.mubr.msk.f32.vlgmr.msra.gmra.mrb[6].mxu0 %vm784_vm1, %v2296_v10  ;;  %1842 = vmatprep.subr.mxu0 %v2178_v4  ;;  %v999_v10 = vld [vmem:[%s3132_s9 + $0x108] sm:$0xff] }
 0x6d4   :  { %1843 = vmatpush3.msra.mxu0 %v782_v61  ;;  %1844 = vmatprep.mubr.msk.f32.mxu0 %vm2177_vm0, %v2178_v4  ;;  %v2020_v63 = vpack.c.bf16 %v999_v10, %v998_v44  ;;  %v997_v61 = vld [vmem:[%s3132_s9 + $0xf8] sm:$0xff]  ;;  %v980_v10 = vld [vmem:[%s3132_s9 + $0x70] sm:$0xff] }
 0x6d5   :  { %2019 = vmatprep.subr.bf16.mxu0 %v2176_v1  ;;  %v2015_v44 = vpack.c.bf16 %v997_v61, %v996_v60  ;;  %v2059_v60 = vpack.c.bf16 %v1184_v59, %v1183_v47  ;;  %v1185_v61 = vld [vmem:[%s3133_s11 + $0xa0] sm:$0xff] }
 0x6d7   :  { %1845 = vmatmul.mubr.msk.f32.vlgmr.msra.gmra.mrb[8].mxu0 %vm784_vm1, %v2301_v11  ;;  %v1001_v11 = vld [vmem:[%s3132_s9 + $0x118] sm:$0xff]  ;;  %2016 = vmatprep.subr.bf16.mxu1 %v2015_v44  ;;  %v1186_v44 = vld [vmem:[%s3133_s11 + $0xa8] sm:$0xff] }
 0x6d8   :  { %1863 = vmatprep.mubr.msk.f32.mxu0 %vm2177_vm0, %v2178_v4  ;;  %2021 = vmatpush3.bf16.msra.mxu0 %v2020_v63  ;;  %v2023_v0 = vpack.c.bf16 %v1001_v11, %v1000_v62  ;;  %v981_v62 = vld [vmem:[%s3132_s9 + $0x78] sm:$0xff]  ;;  %v940_v11 = vsub.s32 3, %v2287_v6  ;;  %v1341_v6 = vld [vmem:[%s3135_s13 + $0x100] sm:$0xff] }
 0x6d9   :  { %2022 = vmatprep.subr.bf16.mxu0 %v2176_v1  ;;  %v2017_v63 = vpack.c.bf16 %v981_v62, %v980_v10  ;;  %v2062_v10 = vpack.c.bf16 %v1186_v44, %v1185_v61  ;;  %v1187_v62 = vld [vmem:[%s3133_s11 + $0xb0] sm:$0xff]  ;;  %v1322_v61 = vld [vmem:[%s3135_s13 + $0x68] sm:$0xff] }
 0x6da   :  { %v1339_v44 = vld [vmem:[%s3135_s13 + $0xf0] sm:$0xff] }
 0x6db   :  { %2018 = vmatpush3.bf16.msra.mxu1 %v2017_v63  ;;  %v1188_v63 = vld [vmem:[%s3133_s11 + $0xb8] sm:$0xff] }
 0x6dc   :  { %2024 = vmatpush3.bf16.msra.mxu0 %v2023_v0 }
 0x6dd   :  { %2025 = vmatprep.subr.bf16.mxu0 %v2176_v1 }
 0x6e0   :  { %2027 = vmatpush3.bf16.msra.mxu0 %v2026_v3 }
 0x6e1   :  { %2028 = vmatprep.subr.bf16.mxu0 %v2176_v1 }
 0x6e4   :  { %2030 = vmatpush3.bf16.msra.mxu0 %v2029_v8 }
 0x6e5   :  { %2031 = vmatprep.subr.bf16.mxu0 %v2176_v1 }
 0x7a6   :  { %v2668_v9 = vpop.f32.mrb[6].mxu0 }
 0x7a7   :  { %v1841_v13 = vpop.f32.mrb[7].mxu0 }
 0x7aa   :  { %v2670_v15 = vpop.f32.mrb[8].mxu0 }
 0x7ab   :  { %930 = vrot.lane.b32.xlu0 %v2670_v15, %s2181_s20  ;;  %v1846_v16 = vpop.f32.mrb[9].mxu0 }
 0x81d   :  { %v931_v0 = vpop.permute.xlu0 %930 }
 0x81e   :  { %v933_v12 = vsel %vm272_vm7, %v2668_v9, %v931_v0  ;;  %v2065_v0 = vpack.c.bf16 %v1188_v63, %v1187_v62 }
 0x81f   :  { %v937_v2 = vrot.slane %v933_v12, %v2383_v46  ;;  %v941_v3 = vrot.slane %v933_v12, %v940_v11  ;;  %v943_v5 = vrot.slane %v933_v12, 5 }
 0x821   :  { %v946_v7 = vsel %vm233_vm4, %v937_v2, %v943_v5  ;;  %v956_v13 = vrot.slane %v941_v3, 3  ;;  %v962_v16 = vrot.slane %v941_v3, 4  ;;  %v1637_v2 = vld [vmem:[%s3134_s10] ss:$0 sm:$0xff] }
 0x822   :  { %v947_v8 = vsel %vm238_vm8, %v946_v7, %v941_v3 }
 0x823   :  { %v961_v17 = vrot.slane %v947_v8, 4  ;;  %v949_v18 = vrot.slane %v947_v8, 1  ;;  %v955_v19 = vrot.slane %v947_v8, 3  ;;  %v953_v26 = vrot.slane %v947_v8, 2 }
 0x825   :  { %v963_v20 = vsel %vm268_vm5, %v961_v17, %v962_v16  ;;  %v957_v21 = vsel %vm258_vm9, %v955_v19, %v956_v13 }
 0x826   :  { %1864 = vmatmul.mubr.msk.f32.vlgmr.msra.gmra.mrb[10].mxu0 %vm275_vm10, %v963_v20  ;;  %v2154_v22 = vpack.i.bf16 %v949_v18, %v957_v21  ;;  %v1325_v21 = vld [vmem:[%s3135_s13 + $0x80] sm:$0xff] }
 0x828   :  { %2155 = vrot.lane.b32.xlu1 %v2154_v22, %s2180_s21  ;;  %v1326_v22 = vld [vmem:[%s3135_s13 + $0x88] sm:$0xff] }
 0x82c   :  { %1270 = vrot.lane.b32.xlu1 %v2668_v9, %s2181_s20  ;;  %v1166_v9 = vld [vmem:[%s3133_s11 + $0x8] sm:$0xff] }
 0x82d   :  { %v2032_v33 = vpack.c.bf16 %v1166_v9, %v1165_v31  ;;  %v1312_v31 = vld [vmem:[%s3135_s13 + $0x18] sm:$0xff]  ;;  %v1329_v9 = vld [vmem:[%s3135_s13 + $0xa0] sm:$0xff] }
 0x82e   :  { %v2075_v34 = vpack.c.bf16 %v1330_v32, %v1329_v9 }
 0x82f   :  { %2033 = vmatpush1.bf16.msra.mxu0 %v2032_v33 }
 0x830   :  { %2034 = vmatprep.subr.bf16.mxu0 %v2176_v1 }
 0x833   :  { %2036 = vmatpush1.bf16.msra.mxu0 %v2035_v35  ;;  %v1313_v35 = vld [vmem:[%s3135_s13 + $0x20] sm:$0xff] }
 0x834   :  { %2037 = vmatprep.subr.bf16.mxu0 %v2176_v1  ;;  %v2077_v39 = vpack.c.bf16 %v1314_v36, %v1313_v35  ;;  %v1343_v35 = vld [vmem:[%s3135_s13 + $0x110] sm:$0xff]  ;;  %v1344_v36 = vld [vmem:[%s3135_s13 + $0x118] sm:$0xff] }
 0x837   :  { %2039 = vmatpush1.bf16.msra.mxu0 %v2038_v38  ;;  %v1332_v38 = vld [vmem:[%s3135_s13 + $0xb8] sm:$0xff] }
 0x838   :  { %2040 = vmatprep.subr.bf16.mxu0 %v2176_v1  ;;  %v2079_v40 = vpack.c.bf16 %v1332_v38, %v1331_v37  ;;  %v2103_v37 = vpack.c.bf16 %v1344_v36, %v1343_v35  ;;  %v1345_v38 = vld [vmem:[%s3135_s13 + $0x120] sm:$0xff] }
 0x83b   :  { %2042 = vmatpush1.bf16.msra.mxu0 %v2041_v41  ;;  %v1315_v41 = vld [vmem:[%s3135_s13 + $0x30] sm:$0xff] }
 0x83c   :  { %2043 = vmatprep.subr.bf16.mxu0 %v2176_v1  ;;  %v2081_v48 = vpack.c.bf16 %v1316_v42, %v1315_v41  ;;  %v1347_v41 = vld [vmem:[%s3135_s13 + $0x130] sm:$0xff] }
 0x83f   :  { %2045 = vmatpush1.bf16.msra.mxu0 %v2044_v45  ;;  %v1334_v45 = vld [vmem:[%s3135_s13 + $0xc8] sm:$0xff] }
 0x840   :  { %2046 = vmatprep.subr.bf16.mxu0 %v2176_v1  ;;  %v2083_v49 = vpack.c.bf16 %v1334_v45, %v1333_v43 }
 0x843   :  { %2048 = vmatpush1.bf16.msra.mxu0 %v2047_v50  ;;  %v1317_v50 = vld [vmem:[%s3135_s13 + $0x40] sm:$0xff] }
 0x844   :  { %2049 = vmatprep.subr.bf16.mxu0 %v2176_v1  ;;  %v2085_v14 = vpack.c.bf16 %v1318_v51, %v1317_v50  ;;  %v1509_v50 = vld [vmem:[%s3137_s15 + $0x8] sm:$0xff]  ;;  %v1510_v51 = vld [vmem:[%s3137_s15 + $0x10] sm:$0xff] }
 0x847   :  { %2051 = vmatpush1.bf16.msra.mxu0 %v2050_v53  ;;  %v1336_v53 = vld [vmem:[%s3135_s13 + $0xd8] sm:$0xff] }
 0x848   :  { %2052 = vmatprep.subr.bf16.mxu0 %v2176_v1  ;;  %v2087_v54 = vpack.c.bf16 %v1336_v53, %v1335_v52  ;;  %v1511_v53 = vld [vmem:[%s3137_s15 + $0x18] sm:$0xff] }
 0x84b   :  { %2054 = vmatpush1.bf16.msra.mxu0 %v2053_v55  ;;  %v1319_v55 = vld [vmem:[%s3135_s13 + $0x50] sm:$0xff] }
 0x84c   :  { %2055 = vmatprep.subr.bf16.mxu0 %v2176_v1  ;;  %v2089_v47 = vpack.c.bf16 %v1320_v56, %v1319_v55  ;;  %v1513_v55 = vld [vmem:[%s3137_s15 + $0x28] sm:$0xff] }
 0x84f   :  { %2057 = vmatpush1.bf16.msra.mxu0 %v2056_v58  ;;  %v1338_v58 = vld [vmem:[%s3135_s13 + $0xe8] sm:$0xff] }
 0x850   :  { %2058 = vmatprep.subr.bf16.mxu0 %v2176_v1  ;;  %v2091_v59 = vpack.c.bf16 %v1338_v58, %v1337_v57  ;;  %v1514_v57 = vld [vmem:[%s3137_s15 + $0x30] sm:$0xff]  ;;  %v1515_v58 = vld [vmem:[%s3137_s15 + $0x38] sm:$0xff] }
 0x853   :  { %2060 = vmatpush1.bf16.msra.mxu0 %v2059_v60  ;;  %v1321_v60 = vld [vmem:[%s3135_s13 + $0x60] sm:$0xff] }
 0x854   :  { %2061 = vmatprep.subr.bf16.mxu0 %v2176_v1  ;;  %v2093_v62 = vpack.c.bf16 %v1322_v61, %v1321_v60  ;;  %v1517_v60 = vld [vmem:[%s3137_s15 + $0x48] sm:$0xff] }
 0x857   :  { %2063 = vmatpush1.bf16.msra.mxu0 %v2062_v10  ;;  %v1340_v10 = vld [vmem:[%s3135_s13 + $0xf8] sm:$0xff] }
 0x858   :  { %2064 = vmatprep.subr.bf16.mxu0 %v2176_v1  ;;  %v2095_v63 = vpack.c.bf16 %v1340_v10, %v1339_v44  ;;  %v1518_v44 = vld [vmem:[%s3137_s15 + $0x50] sm:$0xff]  ;;  %v1519_v10 = vld [vmem:[%s3137_s15 + $0x58] sm:$0xff] }
 0x85b   :  { %2066 = vmatpush1.bf16.msra.mxu0 %v2065_v0  ;;  %v1639_v0 = vld [vmem:[%s3136_s12] ss:$0 sm:$0xff] }
 0x85c   :  { %2111 = vmatprep.subr.bf16.mxu0 %v2176_v1 }
 0x89a   :  { %v2156_v23 = vpop.permute.xlu1 %2155 }
 0x89b   :  { %v2158_v24 = vunpack.i.h.bf16 %v2156_v23  ;;  %v2157_v25 = vunpack.i.l.bf16 %v2156_v23  ;;  %v1309_v23 = vld [vmem:[%s3135_s13] sm:$0xff] }
 0x89d   :  { %v965_v27 = vsel %vm275_vm10, %v953_v26, %v2157_v25  ;;  %v964_v28 = vsel %vm275_vm10, %v947_v8, %v2158_v24  ;;  %v2067_v24 = vpack.c.bf16 %v1326_v22, %v1325_v21  ;;  %v1310_v25 = vld [vmem:[%s3135_s13 + $0x8] sm:$0xff]  ;;  %v1327_v26 = vld [vmem:[%s3135_s13 + $0x90] sm:$0xff] }
 0x89e   :  { %1079 = vmatprep.mubr.f32.mxu1 %v965_v27  ;;  %v1328_v27 = vld [vmem:[%s3135_s13 + $0x98] sm:$0xff] }
 0x89f   :  { %1080 = vmatmul.mubr.f32.vlgmr.msra.gmra.mrb[10].mxu1 %v964_v28  ;;  %v2069_v28 = vpack.c.bf16 %v1310_v25, %v1309_v23  ;;  %2068 = vmatprep.subr.bf16.mxu1 %v2067_v24 }
 0x8a1   :  { %2070 = vmatpush3.bf16.msra.mxu1 %v2069_v28 }
 0x8f9   :  { %v2786_v29 = vpop.f32.mrb[10].mxu0 }
 0x8fa   :  { %v1865_v30 = vpop.f32.mrb[11].mxu0 }
 0x8fb   :  { %v1311_v30 = vld [vmem:[%s3135_s13 + $0x10] sm:$0xff] }
 0x8fc   :  { %v2073_v33 = vpack.c.bf16 %v1312_v31, %v1311_v30 }
 0x972   :  { %v1713_v12 = vpop.f32.mrb[10].mxu1 }
 0x973   :  { %v1714_v3 = vpop.f32.mrb[11].mxu1 }
 0x974   :  { %v1715_v5 = vadd.f32 %v1714_v3, %v1713_v12 }
 0x976   :  { %v1082_v7 = vadd.f32 %v1715_v5, %v1637_v2 }
 0x978   :  { %v1152_v8 = vadd.f32 %v2786_v29, %v1082_v7  ;;  %v2071_v29 = vpack.c.bf16 %v1328_v27, %v1327_v26 }
 0x97a   :  { %vm1155_vm2 = vcmp.ge.f32.partialorder %v1152_v8, 0.0  ;;  %v1156_v13 = vmul.f32 0.01, %v1152_v8  ;;  %2072 = vmatprep.subr.bf16.mxu1 %v2071_v29 }
 0x97b   :  { %2074 = vmatpush3.bf16.msra.mxu1 %v2073_v33 }
 0x97c   :  { %v1157_v16 = vsel %vm1155_vm2, %v1152_v8, %v1156_v13  ;;  %2076 = vmatprep.subr.bf16.mxu1 %v2075_v34  ;;  %v1323_v8 = vld [vmem:[%s3135_s13 + $0x70] sm:$0xff]  ;;  %v1324_v13 = vld [vmem:[%s3135_s13 + $0x78] sm:$0xff] }
 0x97d   :  { %v1163_v17 = vrot.slane %v1157_v16, 2  ;;  %v1159_v18 = vrot.slane %v1157_v16, 1 }
 0x97f   :  { %1640 = vmatprep.mubr.msk.f32.mxu0 %vm275_vm10, %v1163_v17  ;;  %1160 = vrot.lane.b32.xlu0 %v1159_v18, %s2180_s21  ;;  %v2097_v17 = vpack.c.bf16 %v1324_v13, %v1323_v8  ;;  %v1525_v8 = vld [vmem:[%s3137_s15 + $0x88] sm:$0xff] }
 0x980   :  { %2078 = vmatpush3.bf16.msra.mxu1 %v2077_v39  ;;  %v1346_v39 = vld [vmem:[%s3135_s13 + $0x128] sm:$0xff] }
 0x981   :  { %2080 = vmatprep.subr.bf16.mxu1 %v2079_v40  ;;  %v2106_v40 = vpack.c.bf16 %v1346_v39, %v1345_v38 }
 0x984   :  { %2082 = vmatpush3.bf16.msra.mxu1 %v2081_v48 }
 0x985   :  { %2084 = vmatprep.subr.bf16.mxu1 %v2083_v49  ;;  %v1508_v49 = vld [vmem:[%s3137_s15] sm:$0xff] }
 0x986   :  { %v2112_v52 = vpack.c.bf16 %v1509_v50, %v1508_v49 }
 0x988   :  { %2086 = vmatpush3.bf16.msra.mxu1 %v2085_v14  ;;  %v2115_v14 = vpack.c.bf16 %v1511_v53, %v1510_v51 }
 0x989   :  { %2088 = vmatprep.subr.bf16.mxu1 %v2087_v54  ;;  %v1512_v54 = vld [vmem:[%s3137_s15 + $0x20] sm:$0xff] }
 0x98a   :  { %v2118_v56 = vpack.c.bf16 %v1513_v55, %v1512_v54 }
 0x98c   :  { %2090 = vmatpush3.bf16.msra.mxu1 %v2089_v47  ;;  %v2121_v47 = vpack.c.bf16 %v1515_v58, %v1514_v57 }
 0x98d   :  { %2092 = vmatprep.subr.bf16.mxu1 %v2091_v59  ;;  %v1516_v59 = vld [vmem:[%s3137_s15 + $0x40] sm:$0xff] }
 0x98e   :  { %v2124_v61 = vpack.c.bf16 %v1517_v60, %v1516_v59 }
 0x990   :  { %2094 = vmatpush3.bf16.msra.mxu1 %v2093_v62  ;;  %v2127_v62 = vpack.c.bf16 %v1519_v10, %v1518_v44 }
 0x991   :  { %2096 = vmatprep.subr.bf16.mxu1 %v2095_v63  ;;  %v1520_v63 = vld [vmem:[%s3137_s15 + $0x60] sm:$0xff] }
 0x994   :  { %2098 = vmatpush3.bf16.msra.mxu1 %v2097_v17  ;;  %v1527_v17 = vld [vmem:[%s3137_s15 + $0x98] sm:$0xff] }
 0x995   :  { %2099 = vmatprep.subr.bf16.mxu1 %v2176_v1 }
 0x9f1   :  { %v1161_v19 = vpop.permute.xlu0 %1160 }
 0x9f2   :  { %v1164_v20 = vsel %vm275_vm10, %v1157_v16, %v1161_v19  ;;  %v1271_v16 = vpop.permute.xlu1 %1270 }
 0x9f3   :  { %1263 = vmatmul.mubr.f32.vlgmr.msra.gmra.mrb[12].mxu0 %v1164_v20  ;;  %v1273_v19 = vsel %vm272_vm7, %v2670_v15, %v1271_v16  ;;  %v1526_v16 = vld [vmem:[%s3137_s15 + $0x90] sm:$0xff] }
 0x9f4   :  { %2113 = vmatpush1.bf16.msra.mxu0 %v2112_v52 }
 0x9f5   :  { %2114 = vmatprep.subr.bf16.mxu0 %v2176_v1 }
 0x9f8   :  { %2116 = vmatpush1.bf16.msra.mxu0 %v2115_v14 }
 0x9f9   :  { %2117 = vmatprep.subr.bf16.mxu0 %v2176_v1 }
 0x9fc   :  { %2119 = vmatpush1.bf16.msra.mxu0 %v2118_v56 }
 0x9fd   :  { %2120 = vmatprep.subr.bf16.mxu0 %v2176_v1 }
 0xa00   :  { %2122 = vmatpush1.bf16.msra.mxu0 %v2121_v47 }
 0xa01   :  { %2123 = vmatprep.subr.bf16.mxu0 %v2176_v1 }
 0xa04   :  { %2125 = vmatpush1.bf16.msra.mxu0 %v2124_v61 }
 0xa05   :  { %2126 = vmatprep.subr.bf16.mxu0 %v2176_v1 }
 0xa08   :  { %2128 = vmatpush1.bf16.msra.mxu0 %v2127_v62 }
 0xa09   :  { %2129 = vmatprep.subr.bf16.mxu0 %v2176_v1 }
 0xac6   :  { %v1264_v12 = vpop.f32.mrb[12].mxu0 }
 0xac7   :  { %v1265_v2 = vadd.f32 %v1639_v0, %v1264_v12  ;;  %v1266_v3 = vpop.f32.mrb[13].mxu0  ;;  %v1521_v0 = vld [vmem:[%s3137_s15 + $0x68] sm:$0xff] }
 0xac8   :  { %v2130_v12 = vpack.c.bf16 %v1521_v0, %v1520_v63  ;;  %v1523_v3 = vld [vmem:[%s3137_s15 + $0x78] sm:$0xff] }
 0xac9   :  { %2170 = vtanh.f32 %v1265_v2  ;;  %v1522_v2 = vld [vmem:[%s3137_s15 + $0x70] sm:$0xff] }
 0xaca   :  { %2131 = vmatpush1.bf16.msra.mxu0 %v2130_v12 }
 0xacb   :  { %2132 = vmatprep.subr.bf16.mxu0 %v2176_v1 }
 0xad3   :  { %v2171_v5 = vpop.eup %2170 }
 0xad4   :  { %v1274_v7 = vmul.f32 1.442695, %v2171_v5  ;;  %v2133_v5 = vpack.c.bf16 %v1523_v3, %v1522_v2 }
 0xad6   :  { %2172 = vpow2.f32 %v1274_v7  ;;  %v1524_v7 = vld [vmem:[%s3137_s15 + $0x80] sm:$0xff]  ;;  %2134 = vmatpush1.bf16.msra.mxu0 %v2133_v5 }
 0xad7   :  { %v2136_v13 = vpack.c.bf16 %v1525_v8, %v1524_v7  ;;  %2135 = vmatprep.subr.bf16.mxu0 %v2176_v1 }
 0xada   :  { %2137 = vmatpush1.bf16.msra.mxu0 %v2136_v13 }
 0xadb   :  { %2138 = vmatprep.subr.bf16.mxu0 %v2176_v1 }
 0xae0   :  { %v2173_v18 = vpop.eup %2172 }
 0xae1   :  { %v2981_v20 = vmul.f32 %v2173_v18, %v1273_v19  ;;  %v2139_v18 = vpack.c.bf16 %v1527_v17, %v1526_v16  ;;  %v1528_v19 = vld [vmem:[%s3137_s15 + $0xa0] sm:$0xff] }
 0xae3   :  { %v1280_v21 = vrot.slane %v2981_v20, %v2383_v46  ;;  %v1284_v22 = vrot.slane %v2981_v20, %v940_v11  ;;  %v1286_v23 = vrot.slane %v2981_v20, 5  ;;  %v1342_v46 = vld [vmem:[%s3135_s13 + $0x108] sm:$0xff]  ;;  %2140 = vmatpush1.bf16.msra.mxu0 %v2139_v18 }
 0xae4   :  { %v2100_v32 = vpack.c.bf16 %v1342_v46, %v1341_v6  ;;  %2141 = vmatprep.subr.bf16.mxu0 %v2176_v1 }
 0xae5   :  { %v1289_v24 = vsel %vm233_vm4, %v1280_v21, %v1286_v23  ;;  %v1299_v15 = vrot.slane %v1284_v22, 3  ;;  %v1305_v45 = vrot.slane %v1284_v22, 4  ;;  %v1529_v21 = vld [vmem:[%s3137_s15 + $0xa8] sm:$0xff]  ;;  %v1530_v23 = vld [vmem:[%s3137_s15 + $0xb0] sm:$0xff] }
 0xae6   :  { %v1290_v25 = vsel %vm238_vm8, %v1289_v24, %v1284_v22  ;;  %v2142_v22 = vpack.c.bf16 %v1529_v21, %v1528_v19  ;;  %v1531_v24 = vld [vmem:[%s3137_s15 + $0xb8] sm:$0xff] }
 0xae7   :  { %v1292_v26 = vrot.slane %v1290_v25, 1  ;;  %v1298_v27 = vrot.slane %v1290_v25, 3  ;;  %v1296_v9 = vrot.slane %v1290_v25, 2  ;;  %v1304_v43 = vrot.slane %v1290_v25, 4 }
 0xae8   :  { %2143 = vmatpush1.bf16.msra.mxu0 %v2142_v22 }
 0xae9   :  { %v1300_v28 = vsel %vm258_vm9, %v1298_v27, %v1299_v15  ;;  %v1306_v48 = vsel %vm268_vm5, %v1304_v43, %v1305_v45  ;;  %2144 = vmatprep.subr.bf16.mxu0 %v2176_v1 }
 0xaea   :  { %v2159_v29 = vpack.i.bf16 %v1292_v26, %v1300_v28  ;;  %v1641_v28 = vld [vmem:[%s3138_s14] ss:$0 sm:$0xff] }
 0xaec   :  { %2160 = vrot.lane.b32.xlu0 %v2159_v29, %s2180_s21 }
 0xb5e   :  { %v2161_v11 = vpop.permute.xlu0 %2160 }
 0xb5f   :  { %v2163_v30 = vunpack.i.h.bf16 %v2161_v11  ;;  %v2162_v31 = vunpack.i.l.bf16 %v2161_v11 }
 0xb61   :  { %v1308_v33 = vsel %vm275_vm10, %v1296_v9, %v2162_v31  ;;  %v1307_v34 = vsel %vm275_vm10, %v1290_v25, %v2163_v30  ;;  %v2145_v25 = vpack.c.bf16 %v1531_v24, %v1530_v23 }
 0xb62   :  { %1422 = vmatprep.mubr.f32.mxu1 %v1308_v33 }
 0xb63   :  { %1423 = vmatmul.mubr.f32.vlgmr.msra.gmra.mrb[12].mxu1 %v1307_v34  ;;  %2146 = vmatpush1.bf16.msra.mxu0 %v2145_v25  ;;  %v1643_v34 = vld [vmem:[%s3139_s16] ss:$0 sm:$0xff] }
 0xb64   :  { %2101 = vmatpush3.bf16.msra.mxu1 %v2100_v32  ;;  %1882 = vmatprep.mubr.msk.f32.mxu1 %vm2177_vm0, %v2178_v4  ;;  %v1348_v4 = vld [vmem:[%s3135_s13 + $0x138] sm:$0xff] }
 0xb65   :  { %2102 = vmatprep.subr.bf16.mxu1 %v2176_v1  ;;  %v2109_v42 = vpack.c.bf16 %v1348_v4, %v1347_v41 }
 0xb68   :  { %2104 = vmatpush3.bf16.msra.mxu1 %v2103_v37 }
 0xb69   :  { %2105 = vmatprep.subr.bf16.mxu1 %v2176_v1 }
 0xb6c   :  { %2107 = vmatpush3.bf16.msra.mxu1 %v2106_v40 }
 0xb6d   :  { %2108 = vmatprep.subr.bf16.mxu1 %v2176_v1 }
 0xb70   :  { %2110 = vmatpush3.bf16.msra.mxu1 %v2109_v42 }
 0xb73   :  { %1883 = vmatmul.mubr.msk.f32.vlgmr.msra.gmra.mrb[14].mxu1 %vm275_vm10, %v1306_v48 }
 0xc36   :  { %v1757_v26 = vpop.f32.mrb[12].mxu1 }
 0xc37   :  { %v1758_v27 = vpop.f32.mrb[13].mxu1 }
 0xc38   :  { %v1759_v15 = vadd.f32 %v1758_v27, %v1757_v26 }
 0xc3a   :  { %v1425_v29 = vadd.f32 %v1759_v15, %v1641_v28 }
 0xc46   :  { %v1494_v6 = vpop.f32.mrb[14].mxu1 }
 0xc47   :  { %v1495_v46 = vadd.f32 %v1494_v6, %v1425_v29  ;;  %v1884_v11 = vpop.f32.mrb[15].mxu1 }
 0xc49   :  { %vm1498_vm0 = vcmp.ge.f32.partialorder %v1495_v46, 0.0  ;;  %v1499_v30 = vmul.f32 0.01, %v1495_v46 }
 0xc4b   :  { %v1500_v31 = vsel %vm1498_vm0, %v1495_v46, %v1499_v30 }
 0xc4c   :  { %v1506_v9 = vrot.slane %v1500_v31, 2  ;;  %v1502_v32 = vrot.slane %v1500_v31, 1 }
 0xc4e   :  { %1644 = vmatprep.mubr.msk.f32.mxu0 %vm275_vm10, %v1506_v9  ;;  %1503 = vrot.lane.b32.xlu1 %v1502_v32, %s2180_s21 }
 0xcc0   :  { %v1504_v1 = vpop.permute.xlu1 %1503 }
 0xcc1   :  { %v1507_v33 = vsel %vm275_vm10, %v1500_v31, %v1504_v1 }
 0xcc2   :  { %1606 = vmatmul.mubr.f32.vlgmr.msra.gmra.mrb[14].mxu0 %v1507_v33 }
 0xd95   :  { %v1607_v35 = vpop.f32.mrb[14].mxu0 }
 0xd96   :  { %v1608_v36 = vadd.f32 %v1643_v34, %v1607_v35  ;;  %v1609_v37 = vpop.f32.mrb[15].mxu0 }
 0xd98   :  { %2174 = vtanh.f32 %v1608_v36 }
 0xda2   :  { %v2175_v38 = vpop.eup %2174 }
 0xda3   :  { %v1612_v39 = vadd.f32 %v2175_v38, %v2981_v20 }
 0xda5   :  { %1614 = vst.msk [vmem:[%s3140_s18] sm:$0xf] %vm1613_vm3, %v1612_v39 }

</bundles_post_ra>
